<compile_context>
chip_gen: v7x
topology: tpu7x:2x2x1
jax: 0.10.0
libtpu: 0.0.40
codegen_flags: <defaults>
</compile_context>

<pallas_src>
import math

import jax
import jax.numpy as jnp
from jax.experimental import pallas as pl
from jax.experimental.pallas import tpu as pltpu


def _decoder_kernel(z_ref, w1_ref, b1_ref, w2_ref, b2_ref, o_ref):
    z = z_ref[...]                                        # (bt, 2)   f32
    # fc1: K=2 -> two broadcast FMAs on the VPU (skip the MXU entirely).
    h = (z[:, 0:1] * w1_ref[0:1, :]
         + z[:, 1:2] * w1_ref[1:2, :]
         + b1_ref[...])                                   # (bt, 512) f32
    h = jnp.maximum(h, 0.0)                               # ReLU on the VPU
    # fc2: f32 MXU matmul, f32 accumulation (parity with the PyTorch module).
    y = jnp.dot(h, w2_ref[...],
                preferred_element_type=jnp.float32)       # (bt, 784) f32
    y = y + b2_ref[...]
    # sigmoid(y) = 1 / (1 + exp(-y)); exp + approx reciprocal both run on the
    # EUP slot, keeping the VALU / store slots free for the epilogue.
    e = jnp.exp(-y)
    o_ref[...] = pl.reciprocal(1.0 + e, approx=True).astype(o_ref.dtype)


def _round_up(x, m):
    return ((x + m - 1) // m) * m


def prepare_decoder_params(w1, b1, w2, b2):
    """One-time parameter prep, hoisted out of the per-call path.

    Ensures f32 dtypes and (1, H)-shaped bias rows so the kernel can broadcast
    them along sublanes.  Call once; reuse the result for every forward call.
    """
    return (w1.astype(jnp.float32),
            b1.reshape(1, -1).astype(jnp.float32),
            w2.astype(jnp.float32),
            b2.reshape(1, -1).astype(jnp.float32))


def decoder_forward(z, w1, b1, w2, b2, *, block_b=256):
    """z:(B,2)  w1:(2,512) b1:(1,512) w2:(512,784) b2:(1,784) -> (B,784) f32.

    Parameters are expected pre-prepared via `prepare_decoder_params`.
    """
    B, lat = z.shape
    hid = w1.shape[1]
    out_dim = w2.shape[1]

    # Batch tile: keep it a multiple of 8 (or == B), and force >= 2 grid steps
    # when B >= 16 so the "parallel" batch axis can shard across v7x's two
    # TensorCores.  block_b=256 fills v6e's 256-wide MXU; v5e is already full
    # at 128 and all tile choices stay well inside scoped VMEM.
    if B >= 16:
        bt = min(block_b, _round_up(pl.cdiv(B, 2), 8))
    else:
        bt = B
    grid = (pl.cdiv(B, bt),)

    z_f = z.astype(jnp.float32)

    cost = pl.CostEstimate(
        flops=2 * B * hid * out_dim + 4 * B * hid + 2 * B * out_dim,
        transcendentals=2 * B * out_dim,                  # exp + reciprocal
        bytes_accessed=(z_f.size * 4 + w1.size * 4 + b1.size * 4
                        + w2.size * 4 + b2.size * 4 + B * out_dim * 4),
    )

    return pl.pallas_call(
        _decoder_kernel,
        out_shape=jax.ShapeDtypeStruct((B, out_dim), jnp.float32),
        grid_spec=pltpu.PrefetchScalarGridSpec(
            num_scalar_prefetch=0,
            grid=grid,
            in_specs=[
                pl.BlockSpec((bt, lat), lambda i: (i, 0)),       # z tile (pipelined)
                pl.BlockSpec((lat, hid), lambda i: (0, 0)),      # W1: VMEM-resident
                pl.BlockSpec((1, hid), lambda i: (0, 0)),        # b1: VMEM-resident
                pl.BlockSpec((hid, out_dim), lambda i: (0, 0)),  # W2: VMEM-resident
                pl.BlockSpec((1, out_dim), lambda i: (0, 0)),    # b2: VMEM-resident
            ],
            out_specs=pl.BlockSpec((bt, out_dim), lambda i: (i, 0)),
        ),
        compiler_params=pltpu.CompilerParams(
            dimension_semantics=("parallel",),
        ),
        cost_estimate=cost,
    )(z_f, w1, b1, w2, b2)


def init_decoder_params(key):
    """Deterministic init matching nn.Linear's U(-1/sqrt(fan_in), 1/sqrt(fan_in))."""
    k1, k2, k3, k4 = jax.random.split(key, 4)
    fan1, fan2 = 2, 512
    lim1, lim2 = 1.0 / math.sqrt(fan1), 1.0 / math.sqrt(fan2)
    w1 = jax.random.uniform(k1, (2, 512), jnp.float32, -lim1, lim1)
    b1 = jax.random.uniform(k2, (1, 512), jnp.float32, -lim1, lim1)
    w2 = jax.random.uniform(k3, (512, 784), jnp.float32, -lim2, lim2)
    b2 = jax.random.uniform(k4, (1, 784), jnp.float32, -lim2, lim2)
    return w1, b1, w2, b2


def decoder_reference_f32(z, w1, b1, w2, b2):
    h = jnp.maximum(z @ w1 + b1, 0.0)
    return jax.nn.sigmoid(h @ w2 + b2)


if __name__ == "__main__":
    key = jax.random.PRNGKey(0)
    kz, kp = jax.random.split(key)

    B = 8                                                 # small batch
    z = jax.random.normal(kz, (B, 2), jnp.float32)        # latent dim = 2
    params = prepare_decoder_params(*init_decoder_params(kp))  # one-time prep

    out = decoder_forward(z, *params)
    out = jax.block_until_ready(out)
    assert out.shape == (B, 784)
    assert out.dtype == jnp.float32

    ref = decoder_reference_f32(z, *params)
    assert jnp.allclose(out, ref, atol=5e-3, rtol=5e-3), \
        float(jnp.max(jnp.abs(out - ref)))

    print("KERNEL_OK")
</pallas_src>

<mosaic_0001>
module attributes {stable_mosaic.version = 11 : i64} {
  func.func @_decoder_kernel(%arg0: i32, %arg1: memref<8x2xf32, #tpu.memory_space<vmem>>, %arg2: memref<2x512xf32, #tpu.memory_space<vmem>>, %arg3: memref<1x512xf32, #tpu.memory_space<vmem>>, %arg4: memref<512x784xf32, #tpu.memory_space<vmem>>, %arg5: memref<1x784xf32, #tpu.memory_space<vmem>>, %arg6: memref<8x784xf32, #tpu.memory_space<vmem>>) attributes {dimension_semantics = [#tpu.dimension_semantics<parallel>], iteration_bounds = array<i64: 1>, scalar_prefetch = 0 : i64, scratch_operands = 0 : i64, tpu.core_type = #tpu.core_type<tc>, window_params = [{transform_indices = @transform_0, window_bounds = array<i64: 8, 2>}, {pipeline_mode = #tpu.pipeline_mode<synchronous>, transform_indices = @transform_1, window_bounds = array<i64: 2, 512>}, {pipeline_mode = #tpu.pipeline_mode<synchronous>, transform_indices = @transform_2, window_bounds = array<i64: 1, 512>}, {pipeline_mode = #tpu.pipeline_mode<synchronous>, transform_indices = @transform_3, window_bounds = array<i64: 512, 784>}, {pipeline_mode = #tpu.pipeline_mode<synchronous>, transform_indices = @transform_4, window_bounds = array<i64: 1, 784>}, {transform_indices = @transform_5, window_bounds = array<i64: 8, 784>}]} {
    %c0 = arith.constant 0 : index
    %c0_0 = arith.constant 0 : index
    %0 = vector.load %arg1[%c0, %c0_0] : memref<8x2xf32, #tpu.memory_space<vmem>>, vector<8x2xf32>
    %1 = vector.extract_strided_slice %0 {offsets = [0, 0], sizes = [8, 1], strides = [1, 1]} : vector<8x2xf32> to vector<8x1xf32>
    %c0_1 = arith.constant 0 : index
    %c0_2 = arith.constant 0 : index
    %2 = vector.load %arg2[%c0_1, %c0_2] : memref<2x512xf32, #tpu.memory_space<vmem>>, vector<1x512xf32>
    %3 = vector.broadcast %1 : vector<8x1xf32> to vector<8x512xf32>
    %4 = vector.broadcast %2 : vector<1x512xf32> to vector<8x512xf32>
    %5 = arith.mulf %3, %4 : vector<8x512xf32>
    %6 = vector.extract_strided_slice %0 {offsets = [0, 1], sizes = [8, 1], strides = [1, 1]} : vector<8x2xf32> to vector<8x1xf32>
    %c1 = arith.constant 1 : index
    %c0_3 = arith.constant 0 : index
    %7 = vector.load %arg2[%c1, %c0_3] : memref<2x512xf32, #tpu.memory_space<vmem>>, vector<1x512xf32>
    %8 = vector.broadcast %6 : vector<8x1xf32> to vector<8x512xf32>
    %9 = vector.broadcast %7 : vector<1x512xf32> to vector<8x512xf32>
    %10 = arith.mulf %8, %9 : vector<8x512xf32>
    %11 = arith.addf %5, %10 : vector<8x512xf32>
    %c0_4 = arith.constant 0 : index
    %c0_5 = arith.constant 0 : index
    %12 = vector.load %arg3[%c0_4, %c0_5] : memref<1x512xf32, #tpu.memory_space<vmem>>, vector<1x512xf32>
    %13 = vector.broadcast %12 : vector<1x512xf32> to vector<8x512xf32>
    %14 = arith.addf %11, %13 : vector<8x512xf32>
    %cst = arith.constant 0.000000e+00 : f32
    %15 = vector.broadcast %cst : f32 to vector<8x512xf32>
    %16 = arith.maximumf %14, %15 : vector<8x512xf32>
    %c0_6 = arith.constant 0 : index
    %c0_7 = arith.constant 0 : index
    %17 = vector.load %arg4[%c0_6, %c0_7] : memref<512x784xf32, #tpu.memory_space<vmem>>, vector<512x784xf32>
    %cst_8 = arith.constant dense<0.000000e+00> : vector<8x784xf32>
    %18 = tpu.matmul %16, %17, %cst_8 {dimension_numbers = #tpu.dot_dimension_numbers<[1], [0], [0], [1], [0, 0, 1, 1], [], []>} : vector<8x512xf32>, vector<512x784xf32>, vector<8x784xf32> -> vector<8x784xf32>
    %c0_9 = arith.constant 0 : index
    %c0_10 = arith.constant 0 : index
    %19 = vector.load %arg5[%c0_9, %c0_10] : memref<1x784xf32, #tpu.memory_space<vmem>>, vector<1x784xf32>
    %20 = vector.broadcast %19 : vector<1x784xf32> to vector<8x784xf32>
    %21 = arith.addf %18, %20 : vector<8x784xf32>
    %cst_11 = arith.constant 0.000000e+00 : f32
    %22 = vector.broadcast %cst_11 : f32 to vector<8x784xf32>
    %23 = arith.subf %22, %21 : vector<8x784xf32>
    %24 = math.exp %23 : vector<8x784xf32>
    %cst_12 = arith.constant 1.000000e+00 : f32
    %25 = vector.broadcast %cst_12 : f32 to vector<8x784xf32>
    %26 = arith.addf %25, %24 : vector<8x784xf32>
    %27 = tpu.reciprocal %26 {approx = true} : vector<8x784xf32> -> vector<8x784xf32>
    %c0_13 = arith.constant 0 : index
    %c0_14 = arith.constant 0 : index
    %28 = vector.load %arg6[%c0_13, %c0_14] : memref<8x784xf32, #tpu.memory_space<vmem>>, vector<8x784xf32>
    tpu.vector_store %arg6[%c0_13, %c0_14], %27 {strides = array<i32>} : memref<8x784xf32, #tpu.memory_space<vmem>>, vector<8x784xf32>,
    return
  }
  func.func @transform_0(%arg0: i32) -> (i32, i32) {
    %c0_i32 = arith.constant 0 : i32
    %c0_i32_0 = arith.constant 0 : i32
    return %arg0, %c0_i32 : i32, i32
  }
  func.func @transform_1(%arg0: i32) -> (i32, i32) {
    %c0_i32 = arith.constant 0 : i32
    %c0_i32_0 = arith.constant 0 : i32
    %c0_i32_1 = arith.constant 0 : i32
    return %c0_i32, %c0_i32_0 : i32, i32
  }
  func.func @transform_2(%arg0: i32) -> (i32, i32) {
    %c0_i32 = arith.constant 0 : i32
    %c0_i32_0 = arith.constant 0 : i32
    %c0_i32_1 = arith.constant 0 : i32
    return %c0_i32, %c0_i32_0 : i32, i32
  }
  func.func @transform_3(%arg0: i32) -> (i32, i32) {
    %c0_i32 = arith.constant 0 : i32
    %c0_i32_0 = arith.constant 0 : i32
    %c0_i32_1 = arith.constant 0 : i32
    return %c0_i32, %c0_i32_0 : i32, i32
  }
  func.func @transform_4(%arg0: i32) -> (i32, i32) {
    %c0_i32 = arith.constant 0 : i32
    %c0_i32_0 = arith.constant 0 : i32
    %c0_i32_1 = arith.constant 0 : i32
    return %c0_i32, %c0_i32_0 : i32, i32
  }
  func.func @transform_5(%arg0: i32) -> (i32, i32) {
    %c0_i32 = arith.constant 0 : i32
    %c0_i32_0 = arith.constant 0 : i32
    return %arg0, %c0_i32 : i32, i32
  }
}

</mosaic_0001>

<bundles_post_ra>
// kernel: tpu_custom_call.1
= control target key start
LH: loop header
LB: loop body
LE: loop exit
PB: predicated region body
PF: predicated region fallthrough
CT: control target
= control target key end

     0   :  { %v1814_v3 = vmov 0   ;;  %v1815_v26 = vmov 1   ;;  %s3287_s0 = inlined_call_operand.vmem [shape: f32[8,2], index: 0, kind: input, shape index: {}]   ;;  %s3288_s1 = inlined_call_operand.vmem [shape: f32[2,512], index: 1, kind: input, shape index: {}]   ;;  %s3289_s2 = inlined_call_operand.vmem [shape: f32[1,512], index: 2, kind: input, shape index: {}]   ;;  %s3290_s3 = inlined_call_operand.vmem [shape: f32[512,784], index: 3, kind: input, shape index: {}]   ;;  %s3291_s4 = inlined_call_operand.vmem [shape: f32[1,784], index: 4, kind: input, shape index: {}]   ;;  %s3292_s5 = inlined_call_operand.hbm [shape: f32[8,784], index: 5, kind: output, shape index: {}]  }
   0x1   :  { %v21_v0 = vld [vmem:[%s3287_s0] sm:$0xff]  ;;  %v119_v1 = vld [vmem:[%s3290_s3 + $0x8] sm:$0xff]  ;;  %1760 = vset.pattern.permute.xlu0 %v1814_v3  ;;  %v121_v5 = vld [vmem:[%s3290_s3 + $0x18] sm:$0xff] }
   0x2   :  { %v126_v2 = vld [vmem:[%s3290_s3 + $0x40] sm:$0xff]  ;;  %v128_v6 = vld [vmem:[%s3290_s3 + $0x50] sm:$0xff]  ;;  %25 = vperm.xlu0 %1760, %v21_v0   ;;  %v125_v9 = vld [vmem:[%s3290_s3 + $0x38] sm:$0xff] }
   0x3   :  { %v1297_v4 = vpack.c.bf16 %v126_v2, %v119_v1  ;;  %v118_v7 = vld [vmem:[%s3290_s3] sm:$0xff]  ;;  %v1425_v8 = vpack.c.bf16 %v128_v6, %v121_v5  ;;  %v120_v10 = vld [vmem:[%s3290_s3 + $0x10] sm:$0xff]  ;;  %v127_v11 = vld [vmem:[%s3290_s3 + $0x48] sm:$0xff] }
   0x4   :  { %v1299_v12 = vpack.c.bf16 %v125_v9, %v118_v7  ;;  %v1427_v13 = vpack.c.bf16 %v127_v11, %v120_v10  ;;  %v133_v14 = vld [vmem:[%s3290_s3 + $0x78] sm:$0xff]  ;;  %v140_v15 = vld [vmem:[%s3290_s3 + $0xb0] sm:$0xff]  ;;  %v135_v16 = vld [vmem:[%s3290_s3 + $0x88] sm:$0xff] }
   0x5   :  { %1298 = vmatprep.subr.bf16.mxu0 %v1297_v4  ;;  %1426 = vmatprep.subr.bf16.mxu1 %v1425_v8  ;;  %v1301_v17 = vpack.c.bf16 %v140_v15, %v133_v14  ;;  %v142_v18 = vld [vmem:[%s3290_s3 + $0xc0] sm:$0xff]  ;;  %v132_v19 = vld [vmem:[%s3290_s3 + $0x70] sm:$0xff]  ;;  %v139_v20 = vld [vmem:[%s3290_s3 + $0xa8] sm:$0xff] }
   0x6   :  { %1300 = vmatpush1.bf16.msra.mxu0 %v1299_v12  ;;  %1428 = vmatpush1.bf16.msra.mxu1 %v1427_v13  ;;  %v1429_v21 = vpack.c.bf16 %v142_v18, %v135_v16  ;;  %v1303_v22 = vpack.c.bf16 %v139_v20, %v132_v19  ;;  %v134_v23 = vld [vmem:[%s3290_s3 + $0x80] sm:$0xff]  ;;  %v141_v24 = vld [vmem:[%s3290_s3 + $0xb8] sm:$0xff]  ;;  %v147_v25 = vld [vmem:[%s3290_s3 + $0xe8] sm:$0xff] }
   0x7   :  { %1761 = vset.pattern.permute.xlu0 %v1815_v26  ;;  %1302 = vmatprep.subr.bf16.mxu0 %v1301_v17  ;;  %v1431_v27 = vpack.c.bf16 %v141_v24, %v134_v23  ;;  %v154_v28 = vld [vmem:[%s3290_s3 + $0x120] sm:$0xff]  ;;  %v149_v29 = vld [vmem:[%s3290_s3 + $0xf8] sm:$0xff]  ;;  %v156_v30 = vld [vmem:[%s3290_s3 + $0x130] sm:$0xff] }
   0x8   :  { %56 = vperm.xlu0 %1761, %v21_v0   ;;  %1430 = vmatprep.subr.bf16.mxu1 %v1429_v21  ;;  %v1305_v31 = vpack.c.bf16 %v154_v28, %v147_v25  ;;  %v1433_v32 = vpack.c.bf16 %v156_v30, %v149_v29  ;;  %v146_v33 = vld [vmem:[%s3290_s3 + $0xe0] sm:$0xff]  ;;  %v153_v34 = vld [vmem:[%s3290_s3 + $0x118] sm:$0xff]  ;;  %v148_v35 = vld [vmem:[%s3290_s3 + $0xf0] sm:$0xff] }
   0x9   :  { %v155_v36 = vld [vmem:[%s3290_s3 + $0x128] sm:$0xff]  ;;  %v161_v37 = vld [vmem:[%s3290_s3 + $0x158] sm:$0xff]  ;;  %v168_v38 = vld [vmem:[%s3290_s3 + $0x190] sm:$0xff]  ;;  %v1307_v39 = vpack.c.bf16 %v153_v34, %v146_v33 }
   0xa   :  { %1304 = vmatpush1.bf16.msra.mxu0 %v1303_v22  ;;  %1432 = vmatpush1.bf16.msra.mxu1 %v1431_v27  ;;  %v1435_v40 = vpack.c.bf16 %v155_v36, %v148_v35  ;;  %v163_v41 = vld [vmem:[%s3290_s3 + $0x168] sm:$0xff]  ;;  %v170_v42 = vld [vmem:[%s3290_s3 + $0x1a0] sm:$0xff]  ;;  %v160_v43 = vld [vmem:[%s3290_s3 + $0x150] sm:$0xff]  ;;  %v1309_v44 = vpack.c.bf16 %v168_v38, %v161_v37 }
   0xb   :  { %1306 = vmatprep.subr.bf16.mxu0 %v1305_v31  ;;  %1434 = vmatprep.subr.bf16.mxu1 %v1433_v32  ;;  %v1437_v45 = vpack.c.bf16 %v170_v42, %v163_v41  ;;  %v167_v46 = vld [vmem:[%s3290_s3 + $0x188] sm:$0xff]  ;;  %v162_v47 = vld [vmem:[%s3290_s3 + $0x160] sm:$0xff]  ;;  %v169_v48 = vld [vmem:[%s3290_s3 + $0x198] sm:$0xff] }
   0xc   :  { %v175_v49 = vld [vmem:[%s3290_s3 + $0x1c8] sm:$0xff]  ;;  %v182_v50 = vld [vmem:[%s3290_s3 + $0x200] sm:$0xff]  ;;  %v177_v51 = vld [vmem:[%s3290_s3 + $0x1d8] sm:$0xff]  ;;  %v1311_v53 = vpack.c.bf16 %v167_v46, %v160_v43  ;;  %v1439_v54 = vpack.c.bf16 %v169_v48, %v162_v47 }
   0xd   :  { %v184_v52 = vld [vmem:[%s3290_s3 + $0x210] sm:$0xff]  ;;  %v174_v55 = vld [vmem:[%s3290_s3 + $0x1c0] sm:$0xff]  ;;  %v181_v56 = vld [vmem:[%s3290_s3 + $0x1f8] sm:$0xff]  ;;  %v1313_v57 = vpack.c.bf16 %v182_v50, %v175_v49 }
   0xe   :  { %1308 = vmatpush1.bf16.msra.mxu0 %v1307_v39  ;;  %1436 = vmatpush1.bf16.msra.mxu1 %v1435_v40  ;;  %v1441_v58 = vpack.c.bf16 %v184_v52, %v177_v51  ;;  %v176_v59 = vld [vmem:[%s3290_s3 + $0x1d0] sm:$0xff]  ;;  %v183_v60 = vld [vmem:[%s3290_s3 + $0x208] sm:$0xff]  ;;  %v189_v61 = vld [vmem:[%s3290_s3 + $0x238] sm:$0xff]  ;;  %v1315_v1 = vpack.c.bf16 %v181_v56, %v174_v55 }
   0xf   :  { %1310 = vmatprep.subr.bf16.mxu0 %v1309_v44  ;;  %1438 = vmatprep.subr.bf16.mxu1 %v1437_v45  ;;  %v196_v62 = vld [vmem:[%s3290_s3 + $0x270] sm:$0xff]  ;;  %v191_v63 = vld [vmem:[%s3290_s3 + $0x248] sm:$0xff]  ;;  %v198_v0 = vld [vmem:[%s3290_s3 + $0x280] sm:$0xff]  ;;  %v1443_v2 = vpack.c.bf16 %v183_v60, %v176_v59 }
  0x10   :  { %v188_v3 = vld [vmem:[%s3290_s3 + $0x230] sm:$0xff]  ;;  %v195_v4 = vld [vmem:[%s3290_s3 + $0x268] sm:$0xff]  ;;  %v1317_v5 = vpack.c.bf16 %v196_v62, %v189_v61  ;;  %v1445_v6 = vpack.c.bf16 %v198_v0, %v191_v63  ;;  %v190_v7 = vld [vmem:[%s3290_s3 + $0x240] sm:$0xff] }
  0x11   :  { %v197_v8 = vld [vmem:[%s3290_s3 + $0x278] sm:$0xff]  ;;  %v203_v9 = vld [vmem:[%s3290_s3 + $0x2a8] sm:$0xff]  ;;  %v210_v10 = vld [vmem:[%s3290_s3 + $0x2e0] sm:$0xff]  ;;  %v1319_v13 = vpack.c.bf16 %v195_v4, %v188_v3 }
  0x12   :  { %1312 = vmatpush1.bf16.msra.mxu0 %v1311_v53  ;;  %1440 = vmatpush1.bf16.msra.mxu1 %v1439_v54  ;;  %v205_v11 = vld [vmem:[%s3290_s3 + $0x2b8] sm:$0xff]  ;;  %v212_v12 = vld [vmem:[%s3290_s3 + $0x2f0] sm:$0xff]  ;;  %v1447_v14 = vpack.c.bf16 %v197_v8, %v190_v7  ;;  %v202_v15 = vld [vmem:[%s3290_s3 + $0x2a0] sm:$0xff]  ;;  %v1321_v17 = vpack.c.bf16 %v210_v10, %v203_v9 }
  0x13   :  { %1314 = vmatprep.subr.bf16.mxu0 %v1313_v57  ;;  %1442 = vmatprep.subr.bf16.mxu1 %v1441_v58  ;;  %v209_v16 = vld [vmem:[%s3290_s3 + $0x2d8] sm:$0xff]  ;;  %v1449_v18 = vpack.c.bf16 %v212_v12, %v205_v11  ;;  %v204_v19 = vld [vmem:[%s3290_s3 + $0x2b0] sm:$0xff]  ;;  %v211_v20 = vld [vmem:[%s3290_s3 + $0x2e8] sm:$0xff] }
  0x14   :  { %v217_v21 = vld [vmem:[%s3290_s3 + $0x318] sm:$0xff]  ;;  %v224_v22 = vld [vmem:[%s3290_s3 + $0x350] sm:$0xff]  ;;  %v219_v23 = vld [vmem:[%s3290_s3 + $0x328] sm:$0xff]  ;;  %v1323_v25 = vpack.c.bf16 %v209_v16, %v202_v15  ;;  %v1451_v26 = vpack.c.bf16 %v211_v20, %v204_v19 }
  0x15   :  { %v226_v24 = vld [vmem:[%s3290_s3 + $0x360] sm:$0xff]  ;;  %v216_v27 = vld [vmem:[%s3290_s3 + $0x310] sm:$0xff]  ;;  %v223_v28 = vld [vmem:[%s3290_s3 + $0x348] sm:$0xff]  ;;  %v1325_v29 = vpack.c.bf16 %v224_v22, %v217_v21 }
  0x16   :  { %1316 = vmatpush1.bf16.msra.mxu0 %v1315_v1  ;;  %1444 = vmatpush1.bf16.msra.mxu1 %v1443_v2  ;;  %v1453_v30 = vpack.c.bf16 %v226_v24, %v219_v23  ;;  %v218_v31 = vld [vmem:[%s3290_s3 + $0x320] sm:$0xff]  ;;  %v225_v32 = vld [vmem:[%s3290_s3 + $0x358] sm:$0xff]  ;;  %v231_v33 = vld [vmem:[%s3290_s3 + $0x388] sm:$0xff]  ;;  %v1327_v37 = vpack.c.bf16 %v223_v28, %v216_v27 }
  0x17   :  { %1318 = vmatprep.subr.bf16.mxu0 %v1317_v5  ;;  %1446 = vmatprep.subr.bf16.mxu1 %v1445_v6  ;;  %v238_v34 = vld [vmem:[%s3290_s3 + $0x3c0] sm:$0xff]  ;;  %v233_v35 = vld [vmem:[%s3290_s3 + $0x398] sm:$0xff]  ;;  %v240_v36 = vld [vmem:[%s3290_s3 + $0x3d0] sm:$0xff]  ;;  %v1455_v38 = vpack.c.bf16 %v225_v32, %v218_v31 }
  0x18   :  { %v230_v39 = vld [vmem:[%s3290_s3 + $0x380] sm:$0xff]  ;;  %v237_v40 = vld [vmem:[%s3290_s3 + $0x3b8] sm:$0xff]  ;;  %v1329_v41 = vpack.c.bf16 %v238_v34, %v231_v33  ;;  %v1457_v42 = vpack.c.bf16 %v240_v36, %v233_v35  ;;  %v232_v43 = vld [vmem:[%s3290_s3 + $0x390] sm:$0xff] }
  0x19   :  { %v239_v44 = vld [vmem:[%s3290_s3 + $0x3c8] sm:$0xff]  ;;  %v245_v45 = vld [vmem:[%s3290_s3 + $0x3f8] sm:$0xff]  ;;  %v252_v46 = vld [vmem:[%s3290_s3 + $0x430] sm:$0xff]  ;;  %v1331_v49 = vpack.c.bf16 %v237_v40, %v230_v39 }
  0x1a   :  { %1320 = vmatpush1.bf16.msra.mxu0 %v1319_v13  ;;  %1448 = vmatpush1.bf16.msra.mxu1 %v1447_v14  ;;  %v247_v47 = vld [vmem:[%s3290_s3 + $0x408] sm:$0xff]  ;;  %v254_v48 = vld [vmem:[%s3290_s3 + $0x440] sm:$0xff]  ;;  %v1459_v50 = vpack.c.bf16 %v239_v44, %v232_v43  ;;  %v244_v51 = vld [vmem:[%s3290_s3 + $0x3f0] sm:$0xff]  ;;  %v1333_v53 = vpack.c.bf16 %v252_v46, %v245_v45 }
  0x1b   :  { %1322 = vmatprep.subr.bf16.mxu0 %v1321_v17  ;;  %1450 = vmatprep.subr.bf16.mxu1 %v1449_v18  ;;  %v251_v52 = vld [vmem:[%s3290_s3 + $0x428] sm:$0xff]  ;;  %v1461_v54 = vpack.c.bf16 %v254_v48, %v247_v47  ;;  %v246_v55 = vld [vmem:[%s3290_s3 + $0x400] sm:$0xff]  ;;  %v253_v56 = vld [vmem:[%s3290_s3 + $0x438] sm:$0xff] }
  0x1c   :  { %v259_v57 = vld [vmem:[%s3290_s3 + $0x468] sm:$0xff]  ;;  %v266_v58 = vld [vmem:[%s3290_s3 + $0x4a0] sm:$0xff]  ;;  %v261_v59 = vld [vmem:[%s3290_s3 + $0x478] sm:$0xff]  ;;  %v1335_v61 = vpack.c.bf16 %v251_v52, %v244_v51  ;;  %v1463_v62 = vpack.c.bf16 %v253_v56, %v246_v55 }
  0x1d   :  { %v268_v60 = vld [vmem:[%s3290_s3 + $0x4b0] sm:$0xff]  ;;  %v258_v63 = vld [vmem:[%s3290_s3 + $0x460] sm:$0xff]  ;;  %v265_v0 = vld [vmem:[%s3290_s3 + $0x498] sm:$0xff]  ;;  %v1337_v1 = vpack.c.bf16 %v266_v58, %v259_v57 }
  0x1e   :  { %1324 = vmatpush1.bf16.msra.mxu0 %v1323_v25  ;;  %1452 = vmatpush1.bf16.msra.mxu1 %v1451_v26  ;;  %v1465_v2 = vpack.c.bf16 %v268_v60, %v261_v59  ;;  %v260_v3 = vld [vmem:[%s3290_s3 + $0x470] sm:$0xff]  ;;  %v267_v4 = vld [vmem:[%s3290_s3 + $0x4a8] sm:$0xff]  ;;  %v273_v5 = vld [vmem:[%s3290_s3 + $0x4d8] sm:$0xff]  ;;  %v1339_v9 = vpack.c.bf16 %v265_v0, %v258_v63 }
  0x1f   :  { %1326 = vmatprep.subr.bf16.mxu0 %v1325_v29  ;;  %1454 = vmatprep.subr.bf16.mxu1 %v1453_v30  ;;  %v280_v6 = vld [vmem:[%s3290_s3 + $0x510] sm:$0xff]  ;;  %v275_v7 = vld [vmem:[%s3290_s3 + $0x4e8] sm:$0xff]  ;;  %v282_v8 = vld [vmem:[%s3290_s3 + $0x520] sm:$0xff]  ;;  %v1467_v10 = vpack.c.bf16 %v267_v4, %v260_v3 }
  0x20   :  { %v272_v11 = vld [vmem:[%s3290_s3 + $0x4d0] sm:$0xff]  ;;  %v279_v12 = vld [vmem:[%s3290_s3 + $0x508] sm:$0xff]  ;;  %v1341_v13 = vpack.c.bf16 %v280_v6, %v273_v5  ;;  %v1469_v14 = vpack.c.bf16 %v282_v8, %v275_v7  ;;  %v274_v15 = vld [vmem:[%s3290_s3 + $0x4e0] sm:$0xff] }
  0x21   :  { %v281_v16 = vld [vmem:[%s3290_s3 + $0x518] sm:$0xff]  ;;  %v287_v17 = vld [vmem:[%s3290_s3 + $0x548] sm:$0xff]  ;;  %v294_v18 = vld [vmem:[%s3290_s3 + $0x580] sm:$0xff]  ;;  %v1343_v21 = vpack.c.bf16 %v279_v12, %v272_v11 }
  0x22   :  { %1328 = vmatpush1.bf16.msra.mxu0 %v1327_v37  ;;  %1456 = vmatpush1.bf16.msra.mxu1 %v1455_v38  ;;  %v289_v19 = vld [vmem:[%s3290_s3 + $0x558] sm:$0xff]  ;;  %v296_v20 = vld [vmem:[%s3290_s3 + $0x590] sm:$0xff]  ;;  %v1471_v22 = vpack.c.bf16 %v281_v16, %v274_v15  ;;  %v286_v23 = vld [vmem:[%s3290_s3 + $0x540] sm:$0xff]  ;;  %v1345_v25 = vpack.c.bf16 %v294_v18, %v287_v17 }
  0x23   :  { %1330 = vmatprep.subr.bf16.mxu0 %v1329_v41  ;;  %1458 = vmatprep.subr.bf16.mxu1 %v1457_v42  ;;  %v293_v24 = vld [vmem:[%s3290_s3 + $0x578] sm:$0xff]  ;;  %v1473_v26 = vpack.c.bf16 %v296_v20, %v289_v19  ;;  %v288_v27 = vld [vmem:[%s3290_s3 + $0x550] sm:$0xff]  ;;  %v295_v28 = vld [vmem:[%s3290_s3 + $0x588] sm:$0xff] }
  0x24   :  { %v301_v29 = vld [vmem:[%s3290_s3 + $0x5b8] sm:$0xff]  ;;  %v308_v30 = vld [vmem:[%s3290_s3 + $0x5f0] sm:$0xff]  ;;  %v303_v31 = vld [vmem:[%s3290_s3 + $0x5c8] sm:$0xff]  ;;  %v1347_v33 = vpack.c.bf16 %v293_v24, %v286_v23  ;;  %v1475_v34 = vpack.c.bf16 %v295_v28, %v288_v27 }
  0x25   :  { %v310_v32 = vld [vmem:[%s3290_s3 + $0x600] sm:$0xff]  ;;  %v300_v35 = vld [vmem:[%s3290_s3 + $0x5b0] sm:$0xff]  ;;  %v307_v36 = vld [vmem:[%s3290_s3 + $0x5e8] sm:$0xff]  ;;  %v1349_v37 = vpack.c.bf16 %v308_v30, %v301_v29 }
  0x26   :  { %1332 = vmatpush1.bf16.msra.mxu0 %v1331_v49  ;;  %1460 = vmatpush1.bf16.msra.mxu1 %v1459_v50  ;;  %v1477_v38 = vpack.c.bf16 %v310_v32, %v303_v31  ;;  %v302_v39 = vld [vmem:[%s3290_s3 + $0x5c0] sm:$0xff]  ;;  %v309_v40 = vld [vmem:[%s3290_s3 + $0x5f8] sm:$0xff]  ;;  %v315_v41 = vld [vmem:[%s3290_s3 + $0x628] sm:$0xff]  ;;  %v1351_v45 = vpack.c.bf16 %v307_v36, %v300_v35 }
  0x27   :  { %1334 = vmatprep.subr.bf16.mxu0 %v1333_v53  ;;  %1462 = vmatprep.subr.bf16.mxu1 %v1461_v54  ;;  %v322_v42 = vld [vmem:[%s3290_s3 + $0x660] sm:$0xff]  ;;  %v317_v43 = vld [vmem:[%s3290_s3 + $0x638] sm:$0xff]  ;;  %v324_v44 = vld [vmem:[%s3290_s3 + $0x670] sm:$0xff]  ;;  %v1479_v46 = vpack.c.bf16 %v309_v40, %v302_v39 }
  0x28   :  { %v314_v47 = vld [vmem:[%s3290_s3 + $0x620] sm:$0xff]  ;;  %v321_v48 = vld [vmem:[%s3290_s3 + $0x658] sm:$0xff]  ;;  %v1353_v49 = vpack.c.bf16 %v322_v42, %v315_v41  ;;  %v1481_v50 = vpack.c.bf16 %v324_v44, %v317_v43  ;;  %v316_v51 = vld [vmem:[%s3290_s3 + $0x630] sm:$0xff] }
  0x29   :  { %v323_v52 = vld [vmem:[%s3290_s3 + $0x668] sm:$0xff]  ;;  %v329_v53 = vld [vmem:[%s3290_s3 + $0x698] sm:$0xff]  ;;  %v336_v54 = vld [vmem:[%s3290_s3 + $0x6d0] sm:$0xff]  ;;  %v1355_v57 = vpack.c.bf16 %v321_v48, %v314_v47 }
  0x2a   :  { %1336 = vmatpush1.bf16.msra.mxu0 %v1335_v61  ;;  %1464 = vmatpush1.bf16.msra.mxu1 %v1463_v62  ;;  %v331_v55 = vld [vmem:[%s3290_s3 + $0x6a8] sm:$0xff]  ;;  %v338_v56 = vld [vmem:[%s3290_s3 + $0x6e0] sm:$0xff]  ;;  %v1483_v58 = vpack.c.bf16 %v323_v52, %v316_v51  ;;  %v328_v59 = vld [vmem:[%s3290_s3 + $0x690] sm:$0xff]  ;;  %v1357_v61 = vpack.c.bf16 %v336_v54, %v329_v53 }
  0x2b   :  { %1338 = vmatprep.subr.bf16.mxu0 %v1337_v1  ;;  %1466 = vmatprep.subr.bf16.mxu1 %v1465_v2  ;;  %v335_v60 = vld [vmem:[%s3290_s3 + $0x6c8] sm:$0xff]  ;;  %v1485_v62 = vpack.c.bf16 %v338_v56, %v331_v55  ;;  %v330_v63 = vld [vmem:[%s3290_s3 + $0x6a0] sm:$0xff]  ;;  %v337_v0 = vld [vmem:[%s3290_s3 + $0x6d8] sm:$0xff] }
  0x2c   :  { %v343_v1 = vld [vmem:[%s3290_s3 + $0x708] sm:$0xff]  ;;  %v350_v2 = vld [vmem:[%s3290_s3 + $0x740] sm:$0xff]  ;;  %v345_v3 = vld [vmem:[%s3290_s3 + $0x718] sm:$0xff]  ;;  %v1359_v5 = vpack.c.bf16 %v335_v60, %v328_v59  ;;  %v1487_v6 = vpack.c.bf16 %v337_v0, %v330_v63 }
  0x2d   :  { %v352_v4 = vld [vmem:[%s3290_s3 + $0x750] sm:$0xff]  ;;  %v1361_v7 = vpack.c.bf16 %v350_v2, %v343_v1 }
  0x2e   :  { %1340 = vmatpush1.bf16.msra.mxu0 %v1339_v9  ;;  %1468 = vmatpush1.bf16.msra.mxu1 %v1467_v10  ;;  %v1489_v8 = vpack.c.bf16 %v352_v4, %v345_v3 }
  0x2f   :  { %1342 = vmatprep.subr.bf16.mxu0 %v1341_v13  ;;  %1470 = vmatprep.subr.bf16.mxu1 %v1469_v14 }
  0x32   :  { %1344 = vmatpush1.bf16.msra.mxu0 %v1343_v21  ;;  %1472 = vmatpush1.bf16.msra.mxu1 %v1471_v22 }
  0x33   :  { %1346 = vmatprep.subr.bf16.mxu0 %v1345_v25  ;;  %1474 = vmatprep.subr.bf16.mxu1 %v1473_v26 }
  0x36   :  { %1348 = vmatpush1.bf16.msra.mxu0 %v1347_v33  ;;  %1476 = vmatpush1.bf16.msra.mxu1 %v1475_v34 }
  0x37   :  { %1350 = vmatprep.subr.bf16.mxu0 %v1349_v37  ;;  %1478 = vmatprep.subr.bf16.mxu1 %v1477_v38 }
  0x3a   :  { %1352 = vmatpush1.bf16.msra.mxu0 %v1351_v45  ;;  %1480 = vmatpush1.bf16.msra.mxu1 %v1479_v46 }
  0x3b   :  { %1354 = vmatprep.subr.bf16.mxu0 %v1353_v49  ;;  %1482 = vmatprep.subr.bf16.mxu1 %v1481_v50 }
  0x3e   :  { %1356 = vmatpush1.bf16.msra.mxu0 %v1355_v57  ;;  %1484 = vmatpush1.bf16.msra.mxu1 %v1483_v58 }
  0x3f   :  { %1358 = vmatprep.subr.bf16.mxu0 %v1357_v61  ;;  %1486 = vmatprep.subr.bf16.mxu1 %v1485_v62 }
  0x42   :  { %1360 = vmatpush1.bf16.msra.mxu0 %v1359_v5  ;;  %1488 = vmatpush1.bf16.msra.mxu1 %v1487_v6 }
  0x43   :  { %1362 = vmatprep.subr.bf16.mxu0 %v1361_v7  ;;  %1490 = vmatprep.subr.bf16.mxu1 %v1489_v8 }
  0x44   :  { %10 = vsyncpa [#allocation3], 0  ;;  %v29_v9 = vlaneseq  ;;  %v22_v12 = vld [vmem:[%s3288_s1] ss:$2 sm:$0xf]  ;;  %v349_v45 = vld [vmem:[%s3290_s3 + $0x738] sm:$0xff] }
  0x45   :  { %v1226_v17 = vld [vmem:[%s3288_s1 + $0x1] ss:$2 sm:$0xf]  ;;  %v344_v46 = vld [vmem:[%s3290_s3 + $0x710] sm:$0xff]  ;;  %v351_v47 = vld [vmem:[%s3290_s3 + $0x748] sm:$0xff]  ;;  %vm1210_vm0 = vcmask 130048  }
  0x46   :  { %v2246_v10 = vshrl.u32 %v29_v9, 7  ;;  %v88_v23 = vld [vmem:[%s3289_s2] sm:$0xf]  ;;  %v357_v51 = vld [vmem:[%s3290_s3 + $0x778] sm:$0xff]  ;;  %v364_v53 = vld [vmem:[%s3290_s3 + $0x7b0] sm:$0xff]  ;;  %v1491_v59 = vpack.c.bf16 %v351_v47, %v344_v46 }
  0x47   :  { %v342_v44 = vld [vmem:[%s3290_s3 + $0x700] sm:$0xff]  ;;  %v359_v54 = vld [vmem:[%s3290_s3 + $0x788] sm:$0xff]  ;;  %v356_v60 = vld [vmem:[%s3290_s3 + $0x770] sm:$0xff]  ;;  %v1365_v1 = vpack.c.bf16 %v364_v53, %v357_v51 }
  0x48   :  { %v2249_v11 = vsub.s32 2, %v2246_v10  ;;  %v2255_v13 = vsub.s32 0, %v2246_v10  ;;  %v2258_v14 = vsub.s32 1, %v2246_v10  ;;  %v2262_v16 = vsub.s32 3, %v2246_v10  ;;  %v366_v55 = vld [vmem:[%s3290_s3 + $0x7c0] sm:$0xff]  ;;  %v363_v61 = vld [vmem:[%s3290_s3 + $0x7a8] sm:$0xff] }
  0x49   :  { %v1363_v58 = vpack.c.bf16 %v349_v45, %v342_v44  ;;  %v358_v62 = vld [vmem:[%s3290_s3 + $0x780] sm:$0xff]  ;;  %v365_v63 = vld [vmem:[%s3290_s3 + $0x7b8] sm:$0xff]  ;;  %v371_v0 = vld [vmem:[%s3290_s3 + $0x7e8] sm:$0xff]  ;;  %v1493_v2 = vpack.c.bf16 %v366_v55, %v359_v54  ;;  %v1367_v7 = vpack.c.bf16 %v363_v61, %v356_v60 }
  0x4a   :  { %v40_v15 = vrot.slane %v22_v12, %v2249_v11  ;;  %v32_v19 = vrot.slane %v22_v12, %v2255_v13  ;;  %v36_v20 = vrot.slane %v22_v12, %v2258_v14  ;;  %v44_v21 = vrot.slane %v22_v12, %v2262_v16  ;;  %v378_v3 = vld [vmem:[%s3290_s3 + $0x820] sm:$0xff]  ;;  %v373_v4 = vld [vmem:[%s3290_s3 + $0x7f8] sm:$0xff]  ;;  %v380_v5 = vld [vmem:[%s3290_s3 + $0x830] sm:$0xff] }
  0x4b   :  { %v63_v24 = vrot.slane %v1226_v17, %v2255_v13  ;;  %v67_v25 = vrot.slane %v1226_v17, %v2258_v14  ;;  %v71_v26 = vrot.slane %v1226_v17, %v2249_v11  ;;  %v75_v27 = vrot.slane %v1226_v17, %v2262_v16  ;;  %v370_v9 = vld [vmem:[%s3290_s3 + $0x7e0] sm:$0xff]  ;;  %v377_v12 = vld [vmem:[%s3290_s3 + $0x818] sm:$0xff]  ;;  %v420_v45 = vld [vmem:[%s3290_s3 + $0x970] sm:$0xff] }
  0x4c   :  { %v93_v28 = vrot.slane %v88_v23, %v2255_v13  ;;  %v97_v29 = vrot.slane %v88_v23, %v2258_v14  ;;  %v101_v33 = vrot.slane %v88_v23, %v2249_v11  ;;  %v105_v39 = vrot.slane %v88_v23, %v2262_v16  ;;  %v394_v23 = vld [vmem:[%s3290_s3 + $0x8a0] sm:$0xff]  ;;  %v413_v44 = vld [vmem:[%s3290_s3 + $0x938] sm:$0xff]  ;;  %v415_v46 = vld [vmem:[%s3290_s3 + $0x948] sm:$0xff] }
  0x4d   :  { %v1495_v8 = vpack.c.bf16 %v365_v63, %v358_v62  ;;  %v1497_v17 = vpack.c.bf16 %v380_v5, %v373_v4  ;;  %v422_v47 = vld [vmem:[%s3290_s3 + $0x980] sm:$0xff]  ;;  %v412_v51 = vld [vmem:[%s3290_s3 + $0x930] sm:$0xff]  ;;  %v1381_v53 = vpack.c.bf16 %v420_v45, %v413_v44  ;;  %v429_v61 = vld [vmem:[%s3290_s3 + $0x9b8] sm:$0xff] }
  0x4e   :  { %v1509_v54 = vpack.c.bf16 %v422_v47, %v415_v46  ;;  %v414_v55 = vld [vmem:[%s3290_s3 + $0x940] sm:$0xff]  ;;  %v436_v62 = vld [vmem:[%s3290_s3 + $0x9f0] sm:$0xff]  ;;  %v475_v44 = vld [vmem:[%s3290_s3 + $0xb28] sm:$0xff] }
  0x4f   :  { %v434_v60 = vld [vmem:[%s3290_s3 + $0x9e0] sm:$0xff]  ;;  %v1513_v4 = vpack.c.bf16 %v436_v62, %v429_v61  ;;  %v428_v5 = vld [vmem:[%s3290_s3 + $0x9b0] sm:$0xff] }
  0x50   :  { %v470_v47 = vld [vmem:[%s3290_s3 + $0xb00] sm:$0xff]  ;;  %v484_v62 = vld [vmem:[%s3290_s3 + $0xb70] sm:$0xff] }
  0x81   :  { %v26_v18 = vpop.permute.xlu0 %25 }
  0x82   :  { %v51_v22 = vmul.f32 %v40_v15, %v26_v18  ;;  %v49_v30 = vmul.f32 %v32_v19, %v26_v18  ;;  %v50_v31 = vmul.f32 %v36_v20, %v26_v18  ;;  %v52_v32 = vmul.f32 %v44_v21, %v26_v18  ;;  %v372_v18 = vld [vmem:[%s3290_s3 + $0x7f0] sm:$0xff]  ;;  %v379_v19 = vld [vmem:[%s3290_s3 + $0x828] sm:$0xff]  ;;  %v385_v20 = vld [vmem:[%s3290_s3 + $0x858] sm:$0xff] }
  0x83   :  { %v1369_v15 = vpack.c.bf16 %v378_v3, %v371_v0  ;;  %v392_v21 = vld [vmem:[%s3290_s3 + $0x890] sm:$0xff] }
  0x87   :  { %v57_v34 = vpop.permute.xlu0 %56 }
  0x88   :  { %v80_v35 = vmul.f32 %v63_v24, %v57_v34  ;;  %v81_v36 = vmul.f32 %v67_v25, %v57_v34  ;;  %v82_v37 = vmul.f32 %v71_v26, %v57_v34  ;;  %v83_v38 = vmul.f32 %v75_v27, %v57_v34  ;;  %v384_v26 = vld [vmem:[%s3290_s3 + $0x850] sm:$0xff]  ;;  %v391_v27 = vld [vmem:[%s3290_s3 + $0x888] sm:$0xff]  ;;  %v401_v34 = vld [vmem:[%s3290_s3 + $0x8d8] sm:$0xff] }
  0x89   :  { %v1371_v24 = vpack.c.bf16 %v377_v12, %v370_v9  ;;  %v1499_v25 = vpack.c.bf16 %v379_v19, %v372_v18  ;;  %v448_v9 = vld [vmem:[%s3290_s3 + $0xa50] sm:$0xff]  ;;  %v443_v12 = vld [vmem:[%s3290_s3 + $0xa28] sm:$0xff] }
  0x8a   :  { %v84_v40 = vadd.f32 %v80_v35, %v49_v30  ;;  %v85_v41 = vadd.f32 %v81_v36, %v50_v31  ;;  %v86_v42 = vadd.f32 %v82_v37, %v51_v22  ;;  %v87_v43 = vadd.f32 %v83_v38, %v52_v32  ;;  %v387_v22 = vld [vmem:[%s3290_s3 + $0x868] sm:$0xff]  ;;  %v386_v30 = vld [vmem:[%s3290_s3 + $0x860] sm:$0xff]  ;;  %v393_v31 = vld [vmem:[%s3290_s3 + $0x898] sm:$0xff] }
  0x8b   :  { %v399_v32 = vld [vmem:[%s3290_s3 + $0x8c8] sm:$0xff]  ;;  %v408_v35 = vld [vmem:[%s3290_s3 + $0x910] sm:$0xff]  ;;  %v1375_v36 = vpack.c.bf16 %v391_v27, %v384_v26  ;;  %v1503_v37 = vpack.c.bf16 %v393_v31, %v386_v30  ;;  %v398_v38 = vld [vmem:[%s3290_s3 + $0x8c0] sm:$0xff] }
  0x8c   :  { %v110_v48 = vadd.f32 %v93_v28, %v84_v40  ;;  %v111_v49 = vadd.f32 %v97_v29, %v85_v41  ;;  %v2293_v50 = vadd.f32 %v101_v33, %v86_v42  ;;  %v113_v52 = vadd.f32 %v105_v39, %v87_v43  ;;  %v406_v33 = vld [vmem:[%s3290_s3 + $0x900] sm:$0xff]  ;;  %v405_v39 = vld [vmem:[%s3290_s3 + $0x8f8] sm:$0xff]  ;;  %v400_v42 = vld [vmem:[%s3290_s3 + $0x8d0] sm:$0xff] }
  0x8d   :  { %v1373_v28 = vpack.c.bf16 %v392_v21, %v385_v20  ;;  %v1501_v29 = vpack.c.bf16 %v394_v23, %v387_v22  ;;  %v1377_v40 = vpack.c.bf16 %v406_v33, %v399_v32  ;;  %v1505_v41 = vpack.c.bf16 %v408_v35, %v401_v34  ;;  %v407_v43 = vld [vmem:[%s3290_s3 + $0x908] sm:$0xff]  ;;  %v440_v19 = vld [vmem:[%s3290_s3 + $0xa10] sm:$0xff]  ;;  %v442_v23 = vld [vmem:[%s3290_s3 + $0xa20] sm:$0xff] }
  0x8e   :  { %v2307_v56 = vmax.f32 %v111_v49, 0.0  ;;  %v2309_v57 = vmax.f32 %v110_v48, 0.0  ;;  %v2339_v6 = vmax.f32 %v113_v52, 0.0  ;;  %v1379_v48 = vpack.c.bf16 %v405_v39, %v398_v38  ;;  %v419_v52 = vld [vmem:[%s3290_s3 + $0x968] sm:$0xff]  ;;  %v462_v26 = vld [vmem:[%s3290_s3 + $0xac0] sm:$0xff]  ;;  %v457_v27 = vld [vmem:[%s3290_s3 + $0xa98] sm:$0xff] }
  0x8f   :  { %v1507_v49 = vpack.c.bf16 %v407_v43, %v400_v42  ;;  %v1383_v63 = vpack.c.bf16 %v419_v52, %v412_v51  ;;  %v447_v20 = vld [vmem:[%s3290_s3 + $0xa48] sm:$0xff]  ;;  %v454_v31 = vld [vmem:[%s3290_s3 + $0xa80] sm:$0xff]  ;;  %v461_v32 = vld [vmem:[%s3290_s3 + $0xab8] sm:$0xff] }
  0x90   :  { %667 = vmatprep.mubr.f32.mxu0 %v2307_v56  ;;  %809 = vmatprep.mubr.f32.mxu1 %v2307_v56  ;;  %v456_v35 = vld [vmem:[%s3290_s3 + $0xa90] sm:$0xff]  ;;  %v471_v39 = vld [vmem:[%s3290_s3 + $0xb08] sm:$0xff]  ;;  %v490_v51 = vld [vmem:[%s3290_s3 + $0xba0] sm:$0xff] }
  0x91   :  { %668 = vmatmul.mubr.f32.vlgmr.msra.gmra.mrb[0].mxu0 %v2309_v57  ;;  %810 = vmatmul.mubr.f32.vlgmr.msra.gmra.mrb[0].mxu1 %v2309_v57  ;;  %v476_v38 = vld [vmem:[%s3290_s3 + $0xb30] sm:$0xff]  ;;  %v485_v52 = vld [vmem:[%s3290_s3 + $0xb78] sm:$0xff] }
  0x92   :  { %1364 = vmatpush1.bf16.msra.mxu0 %v1363_v58  ;;  %1492 = vmatpush1.bf16.msra.mxu1 %v1491_v59  ;;  %v421_v58 = vld [vmem:[%s3290_s3 + $0x978] sm:$0xff]  ;;  %v427_v59 = vld [vmem:[%s3290_s3 + $0x9a8] sm:$0xff]  ;;  %v468_v43 = vld [vmem:[%s3290_s3 + $0xaf0] sm:$0xff] }
  0x93   :  { %738 = vmatprep.mubr.f32.mxu0 %v2339_v6  ;;  %880 = vmatprep.mubr.f32.mxu1 %v2339_v6  ;;  %v1511_v0 = vpack.c.bf16 %v421_v58, %v414_v55  ;;  %v1385_v3 = vpack.c.bf16 %v434_v60, %v427_v59  ;;  %v482_v58 = vld [vmem:[%s3290_s3 + $0xb60] sm:$0xff]  ;;  %v489_v59 = vld [vmem:[%s3290_s3 + $0xb98] sm:$0xff] }
  0x94   :  { %1366 = vmatprep.subr.bf16.mxu0 %v1365_v1  ;;  %1494 = vmatprep.subr.bf16.mxu1 %v1493_v2  ;;  %v426_v1 = vld [vmem:[%s3290_s3 + $0x9a0] sm:$0xff]  ;;  %v433_v2 = vld [vmem:[%s3290_s3 + $0x9d8] sm:$0xff] }
  0x96   :  { %1368 = vmatpush1.bf16.msra.mxu0 %v1367_v7  ;;  %1496 = vmatpush1.bf16.msra.mxu1 %v1495_v8  ;;  %v435_v7 = vld [vmem:[%s3290_s3 + $0x9e8] sm:$0xff]  ;;  %v441_v8 = vld [vmem:[%s3290_s3 + $0xa18] sm:$0xff] }
  0x97   :  { %1370 = vmatprep.subr.bf16.mxu0 %v1369_v15  ;;  %1498 = vmatprep.subr.bf16.mxu1 %v1497_v17  ;;  %v450_v15 = vld [vmem:[%s3290_s3 + $0xa60] sm:$0xff]  ;;  %v1387_v17 = vpack.c.bf16 %v433_v2, %v426_v1  ;;  %v1515_v18 = vpack.c.bf16 %v435_v7, %v428_v5  ;;  %v1389_v21 = vpack.c.bf16 %v448_v9, %v441_v8  ;;  %v504_v1 = vld [vmem:[%s3290_s3 + $0xc10] sm:$0xff]  ;;  %v499_v2 = vld [vmem:[%s3290_s3 + $0xbe8] sm:$0xff] }
  0x98   :  { %v1517_v22 = vpack.c.bf16 %v450_v15, %v443_v12  ;;  %v496_v7 = vld [vmem:[%s3290_s3 + $0xbd0] sm:$0xff]  ;;  %v503_v8 = vld [vmem:[%s3290_s3 + $0xc08] sm:$0xff]  ;;  %v498_v15 = vld [vmem:[%s3290_s3 + $0xbe0] sm:$0xff] }
  0x9a   :  { %1372 = vmatpush1.bf16.msra.mxu0 %v1371_v24  ;;  %1500 = vmatpush1.bf16.msra.mxu1 %v1499_v25  ;;  %v449_v24 = vld [vmem:[%s3290_s3 + $0xa58] sm:$0xff]  ;;  %v455_v25 = vld [vmem:[%s3290_s3 + $0xa88] sm:$0xff] }
  0x9b   :  { %1374 = vmatprep.subr.bf16.mxu0 %v1373_v28  ;;  %1502 = vmatprep.subr.bf16.mxu1 %v1501_v29  ;;  %v464_v28 = vld [vmem:[%s3290_s3 + $0xad0] sm:$0xff]  ;;  %v1391_v29 = vpack.c.bf16 %v447_v20, %v440_v19  ;;  %v1519_v30 = vpack.c.bf16 %v449_v24, %v442_v23  ;;  %v1393_v33 = vpack.c.bf16 %v462_v26, %v455_v25  ;;  %v518_v19 = vld [vmem:[%s3290_s3 + $0xc80] sm:$0xff]  ;;  %v513_v20 = vld [vmem:[%s3290_s3 + $0xc58] sm:$0xff] }
  0x9c   :  { %v1521_v34 = vpack.c.bf16 %v464_v28, %v457_v27  ;;  %v510_v24 = vld [vmem:[%s3290_s3 + $0xc40] sm:$0xff]  ;;  %v517_v25 = vld [vmem:[%s3290_s3 + $0xc78] sm:$0xff]  ;;  %v512_v28 = vld [vmem:[%s3290_s3 + $0xc50] sm:$0xff] }
  0x9e   :  { %1376 = vmatpush1.bf16.msra.mxu0 %v1375_v36  ;;  %1504 = vmatpush1.bf16.msra.mxu1 %v1503_v37  ;;  %v463_v36 = vld [vmem:[%s3290_s3 + $0xac8] sm:$0xff]  ;;  %v469_v37 = vld [vmem:[%s3290_s3 + $0xaf8] sm:$0xff] }
  0x9f   :  { %1378 = vmatprep.subr.bf16.mxu0 %v1377_v40  ;;  %1506 = vmatprep.subr.bf16.mxu1 %v1505_v41  ;;  %v478_v40 = vld [vmem:[%s3290_s3 + $0xb40] sm:$0xff]  ;;  %v1395_v41 = vpack.c.bf16 %v461_v32, %v454_v31  ;;  %v1523_v42 = vpack.c.bf16 %v463_v36, %v456_v35  ;;  %v1397_v45 = vpack.c.bf16 %v476_v38, %v469_v37  ;;  %v532_v31 = vld [vmem:[%s3290_s3 + $0xcf0] sm:$0xff]  ;;  %v527_v32 = vld [vmem:[%s3290_s3 + $0xcc8] sm:$0xff] }
  0xa0   :  { %v1525_v46 = vpack.c.bf16 %v478_v40, %v471_v39  ;;  %v524_v36 = vld [vmem:[%s3290_s3 + $0xcb0] sm:$0xff]  ;;  %v531_v37 = vld [vmem:[%s3290_s3 + $0xce8] sm:$0xff]  ;;  %v526_v40 = vld [vmem:[%s3290_s3 + $0xcc0] sm:$0xff] }
  0xa2   :  { %1380 = vmatpush1.bf16.msra.mxu0 %v1379_v48  ;;  %1508 = vmatpush1.bf16.msra.mxu1 %v1507_v49  ;;  %v477_v48 = vld [vmem:[%s3290_s3 + $0xb38] sm:$0xff]  ;;  %v483_v49 = vld [vmem:[%s3290_s3 + $0xb68] sm:$0xff] }
  0xa3   :  { %1382 = vmatprep.subr.bf16.mxu0 %v1381_v53  ;;  %1510 = vmatprep.subr.bf16.mxu1 %v1509_v54  ;;  %v492_v53 = vld [vmem:[%s3290_s3 + $0xbb0] sm:$0xff]  ;;  %v1399_v54 = vpack.c.bf16 %v475_v44, %v468_v43  ;;  %v1527_v55 = vpack.c.bf16 %v477_v48, %v470_v47  ;;  %v1401_v60 = vpack.c.bf16 %v490_v51, %v483_v49  ;;  %v546_v43 = vld [vmem:[%s3290_s3 + $0xd60] sm:$0xff]  ;;  %v541_v44 = vld [vmem:[%s3290_s3 + $0xd38] sm:$0xff] }
  0xa4   :  { %v1529_v61 = vpack.c.bf16 %v492_v53, %v485_v52  ;;  %v538_v48 = vld [vmem:[%s3290_s3 + $0xd20] sm:$0xff]  ;;  %v545_v49 = vld [vmem:[%s3290_s3 + $0xd58] sm:$0xff]  ;;  %v540_v53 = vld [vmem:[%s3290_s3 + $0xd30] sm:$0xff] }
  0xa6   :  { %1384 = vmatpush1.bf16.msra.mxu0 %v1383_v63  ;;  %1512 = vmatpush1.bf16.msra.mxu1 %v1511_v0  ;;  %v491_v63 = vld [vmem:[%s3290_s3 + $0xba8] sm:$0xff]  ;;  %v497_v0 = vld [vmem:[%s3290_s3 + $0xbd8] sm:$0xff] }
  0xa7   :  { %1386 = vmatprep.subr.bf16.mxu0 %v1385_v3  ;;  %1514 = vmatprep.subr.bf16.mxu1 %v1513_v4  ;;  %v506_v3 = vld [vmem:[%s3290_s3 + $0xc20] sm:$0xff]  ;;  %v1403_v4 = vpack.c.bf16 %v489_v59, %v482_v58  ;;  %v1531_v5 = vpack.c.bf16 %v491_v63, %v484_v62  ;;  %v1405_v9 = vpack.c.bf16 %v504_v1, %v497_v0  ;;  %v560_v58 = vld [vmem:[%s3290_s3 + $0xdd0] sm:$0xff]  ;;  %v555_v59 = vld [vmem:[%s3290_s3 + $0xda8] sm:$0xff] }
  0xa8   :  { %v1533_v12 = vpack.c.bf16 %v506_v3, %v499_v2  ;;  %v552_v63 = vld [vmem:[%s3290_s3 + $0xd90] sm:$0xff]  ;;  %v559_v0 = vld [vmem:[%s3290_s3 + $0xdc8] sm:$0xff]  ;;  %v554_v3 = vld [vmem:[%s3290_s3 + $0xda0] sm:$0xff] }
  0xaa   :  { %1388 = vmatpush1.bf16.msra.mxu0 %v1387_v17  ;;  %1516 = vmatpush1.bf16.msra.mxu1 %v1515_v18  ;;  %v505_v17 = vld [vmem:[%s3290_s3 + $0xc18] sm:$0xff]  ;;  %v511_v18 = vld [vmem:[%s3290_s3 + $0xc48] sm:$0xff] }
  0xab   :  { %1390 = vmatprep.subr.bf16.mxu0 %v1389_v21  ;;  %1518 = vmatprep.subr.bf16.mxu1 %v1517_v22  ;;  %v520_v21 = vld [vmem:[%s3290_s3 + $0xc90] sm:$0xff]  ;;  %v1407_v22 = vpack.c.bf16 %v503_v8, %v496_v7  ;;  %v1535_v23 = vpack.c.bf16 %v505_v17, %v498_v15  ;;  %v1409_v26 = vpack.c.bf16 %v518_v19, %v511_v18  ;;  %v130_v7 = vld [vmem:[%s3290_s3 + $0x60] sm:$0xff] }
  0xac   :  { %v1537_v27 = vpack.c.bf16 %v520_v21, %v513_v20  ;;  %v236_v8 = vld [vmem:[%s3290_s3 + $0x3b0] sm:$0xff]  ;;  %v122_v19 = vld [vmem:[%s3290_s3 + $0x20] sm:$0xff]  ;;  %v129_v20 = vld [vmem:[%s3290_s3 + $0x58] sm:$0xff] }
  0xad   :  { %v124_v21 = vld [vmem:[%s3290_s3 + $0x30] sm:$0xff] }
  0xae   :  { %1392 = vmatpush1.bf16.msra.mxu0 %v1391_v29  ;;  %1520 = vmatpush1.bf16.msra.mxu1 %v1519_v30  ;;  %v519_v29 = vld [vmem:[%s3290_s3 + $0xc88] sm:$0xff]  ;;  %v525_v30 = vld [vmem:[%s3290_s3 + $0xcb8] sm:$0xff] }
  0xaf   :  { %1394 = vmatprep.subr.bf16.mxu0 %v1393_v33  ;;  %1522 = vmatprep.subr.bf16.mxu1 %v1521_v34  ;;  %v534_v33 = vld [vmem:[%s3290_s3 + $0xd00] sm:$0xff]  ;;  %v1411_v34 = vpack.c.bf16 %v517_v25, %v510_v24  ;;  %v1539_v35 = vpack.c.bf16 %v519_v29, %v512_v28  ;;  %v1413_v38 = vpack.c.bf16 %v532_v31, %v525_v30  ;;  %v144_v24 = vld [vmem:[%s3290_s3 + $0xd0] sm:$0xff]  ;;  %v2704_v28 = vmax.f32 %v2293_v50, 0.0  ;;  %v143_v31 = vld [vmem:[%s3290_s3 + $0xc8] sm:$0xff] }
  0xb0   :  { %v1541_v39 = vpack.c.bf16 %v534_v33, %v527_v32  ;;  %v250_v25 = vld [vmem:[%s3290_s3 + $0x420] sm:$0xff]  ;;  %v136_v30 = vld [vmem:[%s3290_s3 + $0x90] sm:$0xff]  ;;  %v145_v50 = vld [vmem:[%s3290_s3 + $0xd8] sm:$0xff] }
  0xb1   :  { %v138_v32 = vld [vmem:[%s3290_s3 + $0xa0] sm:$0xff] }
  0xb2   :  { %1396 = vmatpush1.bf16.msra.mxu0 %v1395_v41  ;;  %1524 = vmatpush1.bf16.msra.mxu1 %v1523_v42  ;;  %v533_v41 = vld [vmem:[%s3290_s3 + $0xcf8] sm:$0xff]  ;;  %v539_v42 = vld [vmem:[%s3290_s3 + $0xd28] sm:$0xff] }
  0xb3   :  { %1398 = vmatprep.subr.bf16.mxu0 %v1397_v45  ;;  %1526 = vmatprep.subr.bf16.mxu1 %v1525_v46  ;;  %v548_v45 = vld [vmem:[%s3290_s3 + $0xd70] sm:$0xff]  ;;  %v1415_v46 = vpack.c.bf16 %v531_v37, %v524_v36  ;;  %v1543_v47 = vpack.c.bf16 %v533_v41, %v526_v40  ;;  %v1417_v51 = vpack.c.bf16 %v546_v43, %v539_v42  ;;  %v158_v36 = vld [vmem:[%s3290_s3 + $0x140] sm:$0xff]  ;;  %v157_v43 = vld [vmem:[%s3290_s3 + $0x138] sm:$0xff] }
  0xb4   :  { %v1545_v52 = vpack.c.bf16 %v548_v45, %v541_v44  ;;  %v264_v37 = vld [vmem:[%s3290_s3 + $0x490] sm:$0xff]  ;;  %v1687_v40 = vpack.c.bf16 %v145_v50, %v138_v32  ;;  %v150_v42 = vld [vmem:[%s3290_s3 + $0x100] sm:$0xff] }
  0xb5   :  { %v152_v44 = vld [vmem:[%s3290_s3 + $0x110] sm:$0xff]  ;;  %v206_v50 = vld [vmem:[%s3290_s3 + $0x2c0] sm:$0xff] }
  0xb6   :  { %1400 = vmatpush1.bf16.msra.mxu0 %v1399_v54  ;;  %1528 = vmatpush1.bf16.msra.mxu1 %v1527_v55  ;;  %v547_v54 = vld [vmem:[%s3290_s3 + $0xd68] sm:$0xff]  ;;  %v553_v55 = vld [vmem:[%s3290_s3 + $0xd98] sm:$0xff] }
  0xb7   :  { %1402 = vmatprep.subr.bf16.mxu0 %v1401_v60  ;;  %1530 = vmatprep.subr.bf16.mxu1 %v1529_v61  ;;  %v562_v60 = vld [vmem:[%s3290_s3 + $0xde0] sm:$0xff]  ;;  %v1419_v61 = vpack.c.bf16 %v545_v49, %v538_v48  ;;  %v1547_v62 = vpack.c.bf16 %v547_v54, %v540_v53  ;;  %v1421_v1 = vpack.c.bf16 %v560_v58, %v553_v55  ;;  %v285_v49 = vld [vmem:[%s3290_s3 + $0x538] sm:$0xff]  ;;  %v164_v54 = vld [vmem:[%s3290_s3 + $0x170] sm:$0xff] }
  0xb8   :  { %v1549_v2 = vpack.c.bf16 %v562_v60, %v555_v59  ;;  %v278_v48 = vld [vmem:[%s3290_s3 + $0x500] sm:$0xff]  ;;  %v171_v55 = vld [vmem:[%s3290_s3 + $0x1a8] sm:$0xff]  ;;  %v173_v60 = vld [vmem:[%s3290_s3 + $0x1b8] sm:$0xff] }
  0xb9   :  { %v166_v58 = vld [vmem:[%s3290_s3 + $0x180] sm:$0xff]  ;;  %v1693_v59 = vpack.c.bf16 %v285_v49, %v278_v48  ;;  %v229_v49 = vld [vmem:[%s3290_s3 + $0x378] sm:$0xff] }
  0xba   :  { %1404 = vmatpush1.bf16.msra.mxu0 %v1403_v4  ;;  %1532 = vmatpush1.bf16.msra.mxu1 %v1531_v5  ;;  %v561_v4 = vld [vmem:[%s3290_s3 + $0xdd8] sm:$0xff]  ;;  %v123_v5 = vld [vmem:[%s3290_s3 + $0x28] sm:$0xff] }
  0xbb   :  { %1406 = vmatprep.subr.bf16.mxu0 %v1405_v9  ;;  %1534 = vmatprep.subr.bf16.mxu1 %v1533_v12  ;;  %v243_v9 = vld [vmem:[%s3290_s3 + $0x3e8] sm:$0xff]  ;;  %v1423_v12 = vpack.c.bf16 %v559_v0, %v552_v63  ;;  %v1551_v15 = vpack.c.bf16 %v561_v4, %v554_v3  ;;  %v1553_v17 = vpack.c.bf16 %v130_v7, %v123_v5  ;;  %v292_v63 = vld [vmem:[%s3290_s3 + $0x570] sm:$0xff]  ;;  %v178_v4 = vld [vmem:[%s3290_s3 + $0x1e0] sm:$0xff] }
  0xbc   :  { %v1681_v18 = vpack.c.bf16 %v243_v9, %v236_v8  ;;  %v299_v0 = vld [vmem:[%s3290_s3 + $0x5a8] sm:$0xff]  ;;  %v185_v5 = vld [vmem:[%s3290_s3 + $0x218] sm:$0xff]  ;;  %v180_v7 = vld [vmem:[%s3290_s3 + $0x1f0] sm:$0xff] }
  0xbd   :  { %v1697_v8 = vpack.c.bf16 %v299_v0, %v292_v63  ;;  %v187_v9 = vld [vmem:[%s3290_s3 + $0x228] sm:$0xff]  ;;  %v348_v63 = vld [vmem:[%s3290_s3 + $0x730] sm:$0xff] }
  0xbe   :  { %1408 = vmatpush1.bf16.msra.mxu0 %v1407_v22  ;;  %1536 = vmatpush1.bf16.msra.mxu1 %v1535_v23  ;;  %v131_v22 = vld [vmem:[%s3290_s3 + $0x68] sm:$0xff]  ;;  %v137_v23 = vld [vmem:[%s3290_s3 + $0x98] sm:$0xff] }
  0xbf   :  { %1410 = vmatprep.subr.bf16.mxu0 %v1409_v26  ;;  %1538 = vmatprep.subr.bf16.mxu1 %v1537_v27  ;;  %v257_v26 = vld [vmem:[%s3290_s3 + $0x458] sm:$0xff]  ;;  %v1555_v27 = vpack.c.bf16 %v129_v20, %v122_v19  ;;  %v1683_v29 = vpack.c.bf16 %v131_v22, %v124_v21  ;;  %v1557_v33 = vpack.c.bf16 %v144_v24, %v137_v23  ;;  %v192_v22 = vld [vmem:[%s3290_s3 + $0x250] sm:$0xff]  ;;  %v199_v23 = vld [vmem:[%s3290_s3 + $0x288] sm:$0xff] }
  0xc0   :  { %v1571_v19 = vpack.c.bf16 %v185_v5, %v178_v4  ;;  %v1699_v20 = vpack.c.bf16 %v187_v9, %v180_v7  ;;  %v194_v24 = vld [vmem:[%s3290_s3 + $0x260] sm:$0xff]  ;;  %v1575_v32 = vpack.c.bf16 %v199_v23, %v192_v22  ;;  %v355_v0 = vld [vmem:[%s3290_s3 + $0x768] sm:$0xff]  ;;  %v481_v4 = vld [vmem:[%s3290_s3 + $0xb58] sm:$0xff] }
  0xc1   :  { %v1715_v7 = vpack.c.bf16 %v355_v0, %v348_v63  ;;  %v255_v9 = vld [vmem:[%s3290_s3 + $0x448] sm:$0xff]  ;;  %v304_v0 = vld [vmem:[%s3290_s3 + $0x5d0] sm:$0xff] }
  0xc2   :  { %1412 = vmatpush1.bf16.msra.mxu0 %v1411_v34  ;;  %1540 = vmatpush1.bf16.msra.mxu1 %v1539_v35  ;;  %v1685_v34 = vpack.c.bf16 %v257_v26, %v250_v25  ;;  %v151_v35 = vld [vmem:[%s3290_s3 + $0x108] sm:$0xff]  ;;  %v201_v26 = vld [vmem:[%s3290_s3 + $0x298] sm:$0xff] }
  0xc3   :  { %1414 = vmatprep.subr.bf16.mxu0 %v1413_v38  ;;  %1542 = vmatprep.subr.bf16.mxu1 %v1541_v39  ;;  %v271_v38 = vld [vmem:[%s3290_s3 + $0x4c8] sm:$0xff]  ;;  %v1559_v39 = vpack.c.bf16 %v143_v31, %v136_v30  ;;  %v1561_v41 = vpack.c.bf16 %v158_v36, %v151_v35  ;;  %v320_v30 = vld [vmem:[%s3290_s3 + $0x650] sm:$0xff]  ;;  %v213_v35 = vld [vmem:[%s3290_s3 + $0x2f8] sm:$0xff] }
  0xc4   :  { %v1689_v45 = vpack.c.bf16 %v271_v38, %v264_v37  ;;  %v327_v31 = vld [vmem:[%s3290_s3 + $0x688] sm:$0xff]  ;;  %v208_v36 = vld [vmem:[%s3290_s3 + $0x2d0] sm:$0xff] }
  0xc5   :  { %v1705_v37 = vpack.c.bf16 %v327_v31, %v320_v30  ;;  %v215_v38 = vld [vmem:[%s3290_s3 + $0x308] sm:$0xff] }
  0xc6   :  { %1416 = vmatpush1.bf16.msra.mxu0 %v1415_v46  ;;  %1544 = vmatpush1.bf16.msra.mxu1 %v1543_v47  ;;  %v165_v46 = vld [vmem:[%s3290_s3 + $0x178] sm:$0xff]  ;;  %v172_v47 = vld [vmem:[%s3290_s3 + $0x1b0] sm:$0xff]  ;;  %v495_v22 = vld [vmem:[%s3290_s3 + $0xbc8] sm:$0xff] }
  0xc7   :  { %1418 = vmatprep.subr.bf16.mxu0 %v1417_v51  ;;  %1546 = vmatprep.subr.bf16.mxu1 %v1545_v52  ;;  %v1563_v51 = vpack.c.bf16 %v157_v43, %v150_v42  ;;  %v1565_v53 = vpack.c.bf16 %v172_v47, %v165_v46  ;;  %v341_v42 = vld [vmem:[%s3290_s3 + $0x6f8] sm:$0xff]  ;;  %v1579_v43 = vpack.c.bf16 %v213_v35, %v206_v50  ;;  %v227_v46 = vld [vmem:[%s3290_s3 + $0x368] sm:$0xff]  ;;  %v222_v47 = vld [vmem:[%s3290_s3 + $0x340] sm:$0xff] }
  0xc8   :  { %v383_v31 = vld [vmem:[%s3290_s3 + $0x848] sm:$0xff]  ;;  %v509_v50 = vld [vmem:[%s3290_s3 + $0xc38] sm:$0xff] }
  0xca   :  { %1420 = vmatpush1.bf16.msra.mxu0 %v1419_v61  ;;  %1548 = vmatpush1.bf16.msra.mxu1 %v1547_v62  ;;  %v179_v61 = vld [vmem:[%s3290_s3 + $0x1e8] sm:$0xff]  ;;  %v186_v62 = vld [vmem:[%s3290_s3 + $0x220] sm:$0xff] }
  0xcb   :  { %1422 = vmatprep.subr.bf16.mxu0 %v1421_v1  ;;  %1550 = vmatprep.subr.bf16.mxu1 %v1549_v2  ;;  %v1567_v1 = vpack.c.bf16 %v171_v55, %v164_v54  ;;  %v1695_v2 = vpack.c.bf16 %v173_v60, %v166_v58  ;;  %v1569_v3 = vpack.c.bf16 %v186_v62, %v179_v61  ;;  %v467_v54 = vld [vmem:[%s3290_s3 + $0xae8] sm:$0xff]  ;;  %v234_v60 = vld [vmem:[%s3290_s3 + $0x3a0] sm:$0xff]  ;;  %v241_v61 = vld [vmem:[%s3290_s3 + $0x3d8] sm:$0xff] }
  0xcc   :  { %v1711_v58 = vpack.c.bf16 %v229_v49, %v222_v47  ;;  %v1587_v5 = vpack.c.bf16 %v241_v61, %v234_v60  ;;  %v290_v49 = vld [vmem:[%s3290_s3 + $0x560] sm:$0xff]  ;;  %v537_v60 = vld [vmem:[%s3290_s3 + $0xd18] sm:$0xff] }
  0xce   :  { %1424 = vmatpush1.bf16.msra.mxu0 %v1423_v12  ;;  %1552 = vmatpush1.bf16.msra.mxu1 %v1551_v15  ;;  %v193_v12 = vld [vmem:[%s3290_s3 + $0x258] sm:$0xff]  ;;  %v200_v15 = vld [vmem:[%s3290_s3 + $0x290] sm:$0xff] }
  0xcf   :  { %1554 = vmatprep.subr.bf16.mxu0 %v1553_v17  ;;  %1682 = vmatprep.subr.bf16.mxu1 %v1681_v18  ;;  %v306_v17 = vld [vmem:[%s3290_s3 + $0x5e0] sm:$0xff]  ;;  %v313_v18 = vld [vmem:[%s3290_s3 + $0x618] sm:$0xff]  ;;  %v1573_v21 = vpack.c.bf16 %v200_v15, %v193_v12 }
  0xd0   :  { %v1701_v25 = vpack.c.bf16 %v313_v18, %v306_v17  ;;  %v362_v12 = vld [vmem:[%s3290_s3 + $0x7a0] sm:$0xff]  ;;  %v369_v18 = vld [vmem:[%s3290_s3 + $0x7d8] sm:$0xff] }
  0xd1   :  { %739 = vmatmul.mubr.f32.vlgmr.msra.gmra.mrb[0].mxu0 %v2704_v28  ;;  %881 = vmatmul.mubr.f32.vlgmr.msra.gmra.mrb[0].mxu1 %v2704_v28 }
  0xd2   :  { %1556 = vmatpush1.bf16.msra.mxu0 %v1555_v27  ;;  %951 = vmatprep.mubr.f32.mxu0 %v2307_v56  ;;  %v207_v27 = vld [vmem:[%s3290_s3 + $0x2c8] sm:$0xff] }
  0xd3   :  { %1684 = vmatpush3.bf16.msra.mxu1 %v1683_v29  ;;  %1093 = vmatprep.mubr.f32.mxu1 %v2307_v56  ;;  %v159_v56 = vld [vmem:[%s3290_s3 + $0x148] sm:$0xff]  ;;  %v214_v29 = vld [vmem:[%s3290_s3 + $0x300] sm:$0xff] }
  0xd4   :  { %1558 = vmatprep.subr.bf16.mxu0 %v1557_v33  ;;  %1686 = vmatprep.subr.bf16.mxu1 %v1685_v34  ;;  %v1691_v52 = vpack.c.bf16 %v159_v56, %v152_v44  ;;  %v1703_v33 = vpack.c.bf16 %v201_v26, %v194_v24  ;;  %v1577_v34 = vpack.c.bf16 %v214_v29, %v207_v27  ;;  %v220_v56 = vld [vmem:[%s3290_s3 + $0x330] sm:$0xff]  ;;  %v262_v26 = vld [vmem:[%s3290_s3 + $0x480] sm:$0xff]  ;;  %v269_v27 = vld [vmem:[%s3290_s3 + $0x4b8] sm:$0xff] }
  0xd5   :  { %v1707_v44 = vpack.c.bf16 %v215_v38, %v208_v36  ;;  %v1583_v55 = vpack.c.bf16 %v227_v46, %v220_v56  ;;  %v1719_v24 = vpack.c.bf16 %v369_v18, %v362_v12  ;;  %v376_v29 = vld [vmem:[%s3290_s3 + $0x810] sm:$0xff]  ;;  %v1595_v35 = vpack.c.bf16 %v269_v27, %v262_v26  ;;  %v523_v56 = vld [vmem:[%s3290_s3 + $0xca8] sm:$0xff]  ;;  %v318_v18 = vld [vmem:[%s3290_s3 + $0x640] sm:$0xff] }
  0xd6   :  { %1560 = vmatpush1.bf16.msra.mxu0 %v1559_v39  ;;  %v221_v39 = vld [vmem:[%s3290_s3 + $0x338] sm:$0xff]  ;;  %v1723_v36 = vpack.c.bf16 %v383_v31, %v376_v29  ;;  %v276_v38 = vld [vmem:[%s3290_s3 + $0x4f0] sm:$0xff] }
  0xd7   :  { %1688 = vmatpush3.bf16.msra.mxu1 %v1687_v40  ;;  %1562 = vmatprep.subr.bf16.mxu0 %v1561_v41  ;;  %v228_v40 = vld [vmem:[%s3290_s3 + $0x370] sm:$0xff]  ;;  %v334_v41 = vld [vmem:[%s3290_s3 + $0x6c0] sm:$0xff]  ;;  %v565_v26 = vld [vmem:[%s3290_s3 + $0xdf8] sm:$0xff] }
  0xd8   :  { %1690 = vmatprep.subr.bf16.mxu1 %v1689_v45  ;;  %v1581_v45 = vpack.c.bf16 %v228_v40, %v221_v39  ;;  %v1709_v48 = vpack.c.bf16 %v341_v42, %v334_v41  ;;  %v283_v39 = vld [vmem:[%s3290_s3 + $0x528] sm:$0xff]  ;;  %v390_v40 = vld [vmem:[%s3290_s3 + $0x880] sm:$0xff]  ;;  %v397_v42 = vld [vmem:[%s3290_s3 + $0x8b8] sm:$0xff] }
  0xd9   :  { %v1599_v46 = vpack.c.bf16 %v283_v39, %v276_v38  ;;  %v1727_v47 = vpack.c.bf16 %v397_v42, %v390_v40  ;;  %v332_v31 = vld [vmem:[%s3290_s3 + $0x6b0] sm:$0xff]  ;;  %v346_v40 = vld [vmem:[%s3290_s3 + $0x720] sm:$0xff]  ;;  %v361_v42 = vld [vmem:[%s3290_s3 + $0x798] sm:$0xff] }
  0xda   :  { %1564 = vmatpush1.bf16.msra.mxu0 %v1563_v51  ;;  %v235_v51 = vld [vmem:[%s3290_s3 + $0x3a8] sm:$0xff] }
  0xdb   :  { %1692 = vmatpush3.bf16.msra.mxu1 %v1691_v52  ;;  %1566 = vmatprep.subr.bf16.mxu0 %v1565_v53  ;;  %v242_v52 = vld [vmem:[%s3290_s3 + $0x3e0] sm:$0xff]  ;;  %v460_v53 = vld [vmem:[%s3290_s3 + $0xab0] sm:$0xff] }
  0xdc   :  { %1694 = vmatprep.subr.bf16.mxu1 %v1693_v59  ;;  %v1585_v59 = vpack.c.bf16 %v242_v52, %v235_v51  ;;  %v1713_v62 = vpack.c.bf16 %v467_v54, %v460_v53  ;;  %v297_v51 = vld [vmem:[%s3290_s3 + $0x598] sm:$0xff]  ;;  %v404_v52 = vld [vmem:[%s3290_s3 + $0x8f0] sm:$0xff]  ;;  %v411_v54 = vld [vmem:[%s3290_s3 + $0x928] sm:$0xff] }
  0xdd   :  { %v1603_v61 = vpack.c.bf16 %v297_v51, %v290_v49 }
  0xde   :  { %1568 = vmatpush1.bf16.msra.mxu0 %v1567_v1  ;;  %v249_v1 = vld [vmem:[%s3290_s3 + $0x418] sm:$0xff] }
  0xdf   :  { %1696 = vmatpush3.bf16.msra.mxu1 %v1695_v2  ;;  %1570 = vmatprep.subr.bf16.mxu0 %v1569_v3  ;;  %v256_v2 = vld [vmem:[%s3290_s3 + $0x450] sm:$0xff]  ;;  %v474_v3 = vld [vmem:[%s3290_s3 + $0xb20] sm:$0xff] }
  0xe0   :  { %1698 = vmatprep.subr.bf16.mxu1 %v1697_v8  ;;  %v248_v8 = vld [vmem:[%s3290_s3 + $0x410] sm:$0xff]  ;;  %v1589_v15 = vpack.c.bf16 %v256_v2, %v249_v1  ;;  %v1717_v17 = vpack.c.bf16 %v481_v4, %v474_v3  ;;  %v311_v1 = vld [vmem:[%s3290_s3 + $0x608] sm:$0xff]  ;;  %v418_v2 = vld [vmem:[%s3290_s3 + $0x960] sm:$0xff] }
  0xe1   :  { %v1591_v23 = vpack.c.bf16 %v255_v9, %v248_v8  ;;  %v425_v4 = vld [vmem:[%s3290_s3 + $0x998] sm:$0xff]  ;;  %v544_v8 = vld [vmem:[%s3290_s3 + $0xd50] sm:$0xff]  ;;  %v551_v9 = vld [vmem:[%s3290_s3 + $0xd88] sm:$0xff]  ;;  %v1607_v12 = vpack.c.bf16 %v311_v1, %v304_v0 }
  0xe2   :  { %1572 = vmatpush1.bf16.msra.mxu0 %v1571_v19  ;;  %v263_v19 = vld [vmem:[%s3290_s3 + $0x488] sm:$0xff]  ;;  %v402_v0 = vld [vmem:[%s3290_s3 + $0x8e0] sm:$0xff]  ;;  %v409_v1 = vld [vmem:[%s3290_s3 + $0x918] sm:$0xff] }
  0xe3   :  { %1700 = vmatpush3.bf16.msra.mxu1 %v1699_v20  ;;  %1574 = vmatprep.subr.bf16.mxu0 %v1573_v21  ;;  %v270_v20 = vld [vmem:[%s3290_s3 + $0x4c0] sm:$0xff]  ;;  %v488_v21 = vld [vmem:[%s3290_s3 + $0xb90] sm:$0xff] }
  0xe4   :  { %1702 = vmatprep.subr.bf16.mxu1 %v1701_v25  ;;  %v1593_v25 = vpack.c.bf16 %v270_v20, %v263_v19  ;;  %v1721_v30 = vpack.c.bf16 %v495_v22, %v488_v21  ;;  %v325_v19 = vld [vmem:[%s3290_s3 + $0x678] sm:$0xff]  ;;  %v432_v20 = vld [vmem:[%s3290_s3 + $0x9d0] sm:$0xff]  ;;  %v1737_v21 = vpack.c.bf16 %v551_v9, %v544_v8  ;;  %v439_v22 = vld [vmem:[%s3290_s3 + $0xa08] sm:$0xff] }
  0xe5   :  { %v1611_v27 = vpack.c.bf16 %v325_v19, %v318_v18  ;;  %v1739_v29 = vpack.c.bf16 %v439_v22, %v432_v20  ;;  %v423_v8 = vld [vmem:[%s3290_s3 + $0x988] sm:$0xff]  ;;  %v430_v18 = vld [vmem:[%s3290_s3 + $0x9c0] sm:$0xff]  ;;  %v437_v19 = vld [vmem:[%s3290_s3 + $0x9f8] sm:$0xff] }
  0xe6   :  { %1576 = vmatpush1.bf16.msra.mxu0 %v1575_v32  ;;  %v277_v32 = vld [vmem:[%s3290_s3 + $0x4f8] sm:$0xff]  ;;  %v431_v9 = vld [vmem:[%s3290_s3 + $0x9c8] sm:$0xff]  ;;  %v1643_v22 = vpack.c.bf16 %v437_v19, %v430_v18 }
  0xe7   :  { %1704 = vmatpush3.bf16.msra.mxu1 %v1703_v33  ;;  %1578 = vmatprep.subr.bf16.mxu0 %v1577_v34  ;;  %v284_v33 = vld [vmem:[%s3290_s3 + $0x530] sm:$0xff]  ;;  %v502_v34 = vld [vmem:[%s3290_s3 + $0xc00] sm:$0xff]  ;;  %v445_v20 = vld [vmem:[%s3290_s3 + $0xa38] sm:$0xff] }
  0xe8   :  { %1706 = vmatprep.subr.bf16.mxu1 %v1705_v37  ;;  %v1597_v37 = vpack.c.bf16 %v284_v33, %v277_v32  ;;  %v1725_v41 = vpack.c.bf16 %v509_v50, %v502_v34  ;;  %v339_v32 = vld [vmem:[%s3290_s3 + $0x6e8] sm:$0xff]  ;;  %v446_v33 = vld [vmem:[%s3290_s3 + $0xa40] sm:$0xff]  ;;  %v453_v50 = vld [vmem:[%s3290_s3 + $0xa78] sm:$0xff] }
  0xe9   :  { %v1743_v38 = vpack.c.bf16 %v453_v50, %v446_v33  ;;  %v473_v33 = vld [vmem:[%s3290_s3 + $0xb18] sm:$0xff] }
  0xea   :  { %1580 = vmatpush1.bf16.msra.mxu0 %v1579_v43  ;;  %v291_v43 = vld [vmem:[%s3290_s3 + $0x568] sm:$0xff] }
  0xeb   :  { %1708 = vmatpush3.bf16.msra.mxu1 %v1707_v44  ;;  %1582 = vmatprep.subr.bf16.mxu0 %v1581_v45  ;;  %v298_v44 = vld [vmem:[%s3290_s3 + $0x5a0] sm:$0xff]  ;;  %v516_v45 = vld [vmem:[%s3290_s3 + $0xc70] sm:$0xff] }
  0xec   :  { %1710 = vmatprep.subr.bf16.mxu1 %v1709_v48  ;;  %v1601_v48 = vpack.c.bf16 %v298_v44, %v291_v43  ;;  %v1729_v53 = vpack.c.bf16 %v523_v56, %v516_v45  ;;  %v368_v43 = vld [vmem:[%s3290_s3 + $0x7d0] sm:$0xff] }
  0xed   :  { %v1621_v45 = vpack.c.bf16 %v368_v43, %v361_v42  ;;  %v360_v56 = vld [vmem:[%s3290_s3 + $0x790] sm:$0xff]  ;;  %v486_v42 = vld [vmem:[%s3290_s3 + $0xb80] sm:$0xff]  ;;  %v493_v43 = vld [vmem:[%s3290_s3 + $0xbb8] sm:$0xff] }
  0xee   :  { %1584 = vmatpush1.bf16.msra.mxu0 %v1583_v55  ;;  %v305_v55 = vld [vmem:[%s3290_s3 + $0x5d8] sm:$0xff] }
  0xef   :  { %1712 = vmatpush3.bf16.msra.mxu1 %v1711_v58  ;;  %1586 = vmatprep.subr.bf16.mxu0 %v1585_v59  ;;  %v312_v58 = vld [vmem:[%s3290_s3 + $0x610] sm:$0xff]  ;;  %v530_v59 = vld [vmem:[%s3290_s3 + $0xce0] sm:$0xff] }
  0xf0   :  { %1714 = vmatprep.subr.bf16.mxu1 %v1713_v62  ;;  %v1731_v62 = vpack.c.bf16 %v411_v54, %v404_v52  ;;  %v1605_v63 = vpack.c.bf16 %v312_v58, %v305_v55  ;;  %v1733_v3 = vpack.c.bf16 %v537_v60, %v530_v59  ;;  %v374_v52 = vld [vmem:[%s3290_s3 + $0x800] sm:$0xff]  ;;  %v396_v54 = vld [vmem:[%s3290_s3 + $0x8b0] sm:$0xff]  ;;  %v395_v59 = vld [vmem:[%s3290_s3 + $0x8a8] sm:$0xff] }
  0xf1   :  { %v388_v58 = vld [vmem:[%s3290_s3 + $0x870] sm:$0xff]  ;;  %v403_v60 = vld [vmem:[%s3290_s3 + $0x8e8] sm:$0xff] }
  0xf2   :  { %1094 = vmatmul.mubr.f32.vlgmr.msra.gmra.mrb[2].mxu1 %v2309_v57  ;;  %1588 = vmatpush1.bf16.msra.mxu0 %v1587_v5  ;;  %v319_v5 = vld [vmem:[%s3290_s3 + $0x648] sm:$0xff] }
  0xf3   :  { %1716 = vmatpush3.bf16.msra.mxu1 %v1715_v7  ;;  %1163 = vmatprep.mubr.f32.mxu1 %v2339_v6  ;;  %v326_v7 = vld [vmem:[%s3290_s3 + $0x680] sm:$0xff] }
  0xf4   :  { %1590 = vmatprep.subr.bf16.mxu0 %v1589_v15  ;;  %1718 = vmatprep.subr.bf16.mxu1 %v1717_v17  ;;  %v1735_v15 = vpack.c.bf16 %v425_v4, %v418_v2  ;;  %v1609_v17 = vpack.c.bf16 %v326_v7, %v319_v5  ;;  %v417_v2 = vld [vmem:[%s3290_s3 + $0x958] sm:$0xff]  ;;  %v1635_v4 = vpack.c.bf16 %v409_v1, %v402_v0  ;;  %v416_v7 = vld [vmem:[%s3290_s3 + $0x950] sm:$0xff] }
  0xf6   :  { %1592 = vmatpush1.bf16.msra.mxu0 %v1591_v23  ;;  %v333_v23 = vld [vmem:[%s3290_s3 + $0x6b8] sm:$0xff] }
  0xf7   :  { %1720 = vmatpush3.bf16.msra.mxu1 %v1719_v24  ;;  %1594 = vmatprep.subr.bf16.mxu0 %v1593_v25  ;;  %v340_v24 = vld [vmem:[%s3290_s3 + $0x6f0] sm:$0xff]  ;;  %v558_v25 = vld [vmem:[%s3290_s3 + $0xdc0] sm:$0xff] }
  0xf8   :  { %1722 = vmatprep.subr.bf16.mxu1 %v1721_v30  ;;  %v1613_v30 = vpack.c.bf16 %v340_v24, %v333_v23  ;;  %v1741_v34 = vpack.c.bf16 %v565_v26, %v558_v25  ;;  %v444_v24 = vld [vmem:[%s3290_s3 + $0xa30] sm:$0xff]  ;;  %v451_v25 = vld [vmem:[%s3290_s3 + $0xa68] sm:$0xff] }
  0xf9   :  { %v459_v26 = vld [vmem:[%s3290_s3 + $0xaa8] sm:$0xff] }
  0xfa   :  { %1596 = vmatpush1.bf16.msra.mxu0 %v1595_v35  ;;  %v347_v35 = vld [vmem:[%s3290_s3 + $0x728] sm:$0xff] }
  0xfb   :  { %1724 = vmatpush3.bf16.msra.mxu1 %v1723_v36  ;;  %1598 = vmatprep.subr.bf16.mxu0 %v1597_v37  ;;  %v354_v36 = vld [vmem:[%s3290_s3 + $0x760] sm:$0xff]  ;;  %v1615_v37 = vpack.c.bf16 %v339_v32, %v332_v31  ;;  %v465_v32 = vld [vmem:[%s3290_s3 + $0xad8] sm:$0xff] }
  0xfc   :  { %1726 = vmatprep.subr.bf16.mxu1 %v1725_v41  ;;  %v1617_v39 = vpack.c.bf16 %v354_v36, %v347_v35  ;;  %v353_v41 = vld [vmem:[%s3290_s3 + $0x758] sm:$0xff]  ;;  %v458_v31 = vld [vmem:[%s3290_s3 + $0xaa0] sm:$0xff]  ;;  %v472_v36 = vld [vmem:[%s3290_s3 + $0xb10] sm:$0xff] }
  0xfd   :  { %v1619_v44 = vpack.c.bf16 %v353_v41, %v346_v40  ;;  %v1651_v50 = vpack.c.bf16 %v465_v32, %v458_v31 }
  0xfe   :  { %1600 = vmatpush1.bf16.msra.mxu0 %v1599_v46  ;;  %v367_v46 = vld [vmem:[%s3290_s3 + $0x7c8] sm:$0xff] }
  0xff   :  { %1728 = vmatpush3.bf16.msra.mxu1 %v1727_v47  ;;  %1602 = vmatprep.subr.bf16.mxu0 %v1601_v48  ;;  %v375_v47 = vld [vmem:[%s3290_s3 + $0x808] sm:$0xff]  ;;  %v382_v48 = vld [vmem:[%s3290_s3 + $0x840] sm:$0xff]  ;;  %v1623_v49 = vpack.c.bf16 %v367_v46, %v360_v56  ;;  %v1659_v56 = vpack.c.bf16 %v493_v43, %v486_v42 }
 0x100   :  { %1730 = vmatprep.subr.bf16.mxu1 %v1729_v53  ;;  %v1625_v51 = vpack.c.bf16 %v382_v48, %v375_v47  ;;  %v381_v53 = vld [vmem:[%s3290_s3 + $0x838] sm:$0xff]  ;;  %v500_v47 = vld [vmem:[%s3290_s3 + $0xbf0] sm:$0xff]  ;;  %v507_v48 = vld [vmem:[%s3290_s3 + $0xc28] sm:$0xff] }
 0x102   :  { %1604 = vmatpush1.bf16.msra.mxu0 %v1603_v61  ;;  %v410_v61 = vld [vmem:[%s3290_s3 + $0x920] sm:$0xff] }
 0x103   :  { %1732 = vmatpush3.bf16.msra.mxu1 %v1731_v62  ;;  %1606 = vmatprep.subr.bf16.mxu0 %v1605_v63  ;;  %v1631_v62 = vpack.c.bf16 %v395_v59, %v388_v58  ;;  %v1633_v63 = vpack.c.bf16 %v410_v61, %v403_v60  ;;  %v528_v60 = vld [vmem:[%s3290_s3 + $0xcd0] sm:$0xff]  ;;  %v535_v61 = vld [vmem:[%s3290_s3 + $0xd08] sm:$0xff] }
 0x104   :  { %1734 = vmatprep.subr.bf16.mxu1 %v1733_v3  ;;  %v424_v3 = vld [vmem:[%s3290_s3 + $0x990] sm:$0xff]  ;;  %v1671_v0 = vpack.c.bf16 %v535_v61, %v528_v60  ;;  %v586_v60 = vsub.s32 4, %v2246_v10  ;;  %v590_v61 = vsub.s32 5, %v2246_v10 }
 0x105   :  { %v1637_v5 = vpack.c.bf16 %v424_v3, %v417_v2  ;;  %v542_v2 = vld [vmem:[%s3290_s3 + $0xd40] sm:$0xff]  ;;  %v549_v3 = vld [vmem:[%s3290_s3 + $0xd78] sm:$0xff] }
 0x106   :  { %1608 = vmatpush1.bf16.msra.mxu0 %v1607_v12  ;;  %v438_v12 = vld [vmem:[%s3290_s3 + $0xa00] sm:$0xff] }
 0x107   :  { %1736 = vmatpush3.bf16.msra.mxu1 %v1735_v15  ;;  %1610 = vmatprep.subr.bf16.mxu0 %v1609_v17  ;;  %v1639_v15 = vpack.c.bf16 %v423_v8, %v416_v7  ;;  %v1641_v17 = vpack.c.bf16 %v438_v12, %v431_v9  ;;  %v1675_v7 = vpack.c.bf16 %v549_v3, %v542_v2  ;;  %v556_v9 = vld [vmem:[%s3290_s3 + $0xdb0] sm:$0xff]  ;;  %v563_v12 = vld [vmem:[%s3290_s3 + $0xde8] sm:$0xff] }
 0x108   :  { %1738 = vmatprep.subr.bf16.mxu1 %v1737_v21  ;;  %v452_v21 = vld [vmem:[%s3290_s3 + $0xa70] sm:$0xff] }
 0x109   :  { %v1645_v23 = vpack.c.bf16 %v452_v21, %v445_v20 }
 0x10a   :  { %1612 = vmatpush1.bf16.msra.mxu0 %v1611_v27  ;;  %v466_v27 = vld [vmem:[%s3290_s3 + $0xae0] sm:$0xff] }
 0x10b   :  { %1740 = vmatpush3.bf16.msra.mxu1 %v1739_v29  ;;  %1614 = vmatprep.subr.bf16.mxu0 %v1613_v30  ;;  %v1647_v29 = vpack.c.bf16 %v451_v25, %v444_v24  ;;  %v1649_v30 = vpack.c.bf16 %v466_v27, %v459_v26 }
 0x10c   :  { %1742 = vmatprep.subr.bf16.mxu1 %v1741_v34  ;;  %v480_v34 = vld [vmem:[%s3290_s3 + $0xb50] sm:$0xff] }
 0x10d   :  { %v1653_v35 = vpack.c.bf16 %v480_v34, %v473_v33 }
 0x10e   :  { %1616 = vmatpush1.bf16.msra.mxu0 %v1615_v37  ;;  %v479_v37 = vld [vmem:[%s3290_s3 + $0xb48] sm:$0xff] }
 0x10f   :  { %1744 = vmatpush3.bf16.msra.mxu1 %v1743_v38  ;;  %1618 = vmatprep.subr.bf16.mxu0 %v1617_v39  ;;  %v487_v38 = vld [vmem:[%s3290_s3 + $0xb88] sm:$0xff]  ;;  %v494_v39 = vld [vmem:[%s3290_s3 + $0xbc0] sm:$0xff]  ;;  %v1655_v40 = vpack.c.bf16 %v479_v37, %v472_v36 }
 0x110   :  { %v1657_v41 = vpack.c.bf16 %v494_v39, %v487_v38 }
 0x111   :  { %952 = vmatmul.mubr.f32.vlgmr.msra.gmra.mrb[2].mxu0 %v2309_v57  ;;  %v389_v57 = vld [vmem:[%s3290_s3 + $0x878] sm:$0xff] }
 0x112   :  { %1164 = vmatmul.mubr.f32.vlgmr.msra.gmra.mrb[4].mxu1 %v2704_v28  ;;  %1620 = vmatpush1.bf16.msra.mxu0 %v1619_v44  ;;  %v1629_v55 = vpack.c.bf16 %v396_v54, %v389_v57  ;;  %v501_v44 = vld [vmem:[%s3290_s3 + $0xbf8] sm:$0xff]  ;;  %v514_v57 = vld [vmem:[%s3290_s3 + $0xc60] sm:$0xff] }
 0x113   :  { %1022 = vmatprep.mubr.f32.mxu0 %v2339_v6  ;;  %1622 = vmatprep.subr.bf16.mxu0 %v1621_v45  ;;  %v1627_v6 = vpack.c.bf16 %v381_v53, %v374_v52  ;;  %v508_v45 = vld [vmem:[%s3290_s3 + $0xc30] sm:$0xff]  ;;  %v1663_v52 = vpack.c.bf16 %v507_v48, %v500_v47  ;;  %v521_v54 = vld [vmem:[%s3290_s3 + $0xc98] sm:$0xff]  ;;  %v594_v47 = vsub.s32 6, %v2246_v10 }
 0x114   :  { %v1661_v46 = vpack.c.bf16 %v508_v45, %v501_v44  ;;  %v1667_v58 = vpack.c.bf16 %v521_v54, %v514_v57 }
 0x116   :  { %1624 = vmatpush1.bf16.msra.mxu0 %v1623_v49  ;;  %v515_v49 = vld [vmem:[%s3290_s3 + $0xc68] sm:$0xff] }
 0x117   :  { %1626 = vmatprep.subr.bf16.mxu0 %v1625_v51  ;;  %v522_v51 = vld [vmem:[%s3290_s3 + $0xca0] sm:$0xff] }
 0x118   :  { %v1665_v53 = vpack.c.bf16 %v522_v51, %v515_v49 }
 0x11a   :  { %1628 = vmatpush1.bf16.msra.mxu0 %v1627_v6  ;;  %v529_v6 = vld [vmem:[%s3290_s3 + $0xcd8] sm:$0xff] }
 0x11b   :  { %1630 = vmatprep.subr.bf16.mxu0 %v1629_v55  ;;  %v536_v55 = vld [vmem:[%s3290_s3 + $0xd10] sm:$0xff] }
 0x11c   :  { %v1669_v59 = vpack.c.bf16 %v536_v55, %v529_v6 }
 0x11e   :  { %1632 = vmatpush1.bf16.msra.mxu0 %v1631_v62  ;;  %v543_v62 = vld [vmem:[%s3290_s3 + $0xd48] sm:$0xff] }
 0x11f   :  { %1634 = vmatprep.subr.bf16.mxu0 %v1633_v63  ;;  %v550_v63 = vld [vmem:[%s3290_s3 + $0xd80] sm:$0xff] }
 0x120   :  { %v1673_v1 = vpack.c.bf16 %v550_v63, %v543_v62 }
 0x122   :  { %1636 = vmatpush1.bf16.msra.mxu0 %v1635_v4  ;;  %v557_v4 = vld [vmem:[%s3290_s3 + $0xdb8] sm:$0xff] }
 0x123   :  { %1638 = vmatprep.subr.bf16.mxu0 %v1637_v5  ;;  %v564_v5 = vld [vmem:[%s3290_s3 + $0xdf0] sm:$0xff]  ;;  %s1816_s3 = smov [#allocation2]  }
 0x124   :  { %v1677_v8 = vpack.c.bf16 %v564_v5, %v557_v4 }
 0x126   :  { %1640 = vmatpush1.bf16.msra.mxu0 %v1639_v15  ;;  %v1679_v15 = vpack.c.bf16 %v563_v12, %v556_v9 }
 0x127   :  { %1642 = vmatprep.subr.bf16.mxu0 %v1641_v17  ;;  %v3259_v17 = vld [vmem:[%s3291_s4] sm:$0x7f]  ;;  %s1218_s4 = sshll.u32 %s1816_s3, 4  ;;  %s1219_s4 = int_to_ptr.vmem [resolvable:$true] %s1218_s4 }
 0x128   :  { %v571_v18 = vrot.slane %v3259_v17, %v2255_v13  ;;  %v579_v19 = vrot.slane %v3259_v17, %v2249_v11  ;;  %v575_v20 = vrot.slane %v3259_v17, %v2258_v14  ;;  %v583_v21 = vrot.slane %v3259_v17, %v2262_v16  ;;  %s1790_s20 = scalar_lea.vmem %s1219_s4, 896  ;;  %p1795_p1 = scmp.lt.s32.totalorder %s1219_s4, %s1219_s4 }
 0x129   :  { %v595_v48 = vrot.slane %v3259_v17, %v594_v47  ;;  %v587_v62 = vrot.slane %v3259_v17, %v586_v60  ;;  %v591_v63 = vrot.slane %v3259_v17, %v590_v61  ;;  %p1791_p0 = scmp.ne.s32.totalorder %s1219_s4, %s1790_s20  ;;  %p1796_p2 = scmp.lt.s32.totalorder %s1790_s20, %s1790_s20 }
 0x12a   :  { %1644 = vmatpush1.bf16.msra.mxu0 %v1643_v22 }
 0x12b   :  { %1646 = vmatprep.subr.bf16.mxu0 %v1645_v23  ;;  %p1797_p3 = por %p1796_p2, %p1795_p1 }
 0x12d   :  { %p1798_p4 = pnand %p1797_p3, %p1791_p0 }
 0x12e   :  { %1648 = vmatpush1.bf16.msra.mxu0 %v1647_v29 }
 0x12f   :  { %1650 = vmatprep.subr.bf16.mxu0 %v1649_v30 }
 0x132   :  { %1652 = vmatpush1.bf16.msra.mxu0 %v1651_v50 }
 0x133   :  { %1654 = vmatprep.subr.bf16.mxu0 %v1653_v35 }
 0x136   :  { %1656 = vmatpush1.bf16.msra.mxu0 %v1655_v40 }
 0x137   :  { %1658 = vmatprep.subr.bf16.mxu0 %v1657_v41 }
 0x13a   :  { %1660 = vmatpush1.bf16.msra.mxu0 %v1659_v56 }
 0x13b   :  { %1662 = vmatprep.subr.bf16.mxu0 %v1661_v46 }
 0x13e   :  { %1664 = vmatpush1.bf16.msra.mxu0 %v1663_v52 }
 0x13f   :  { %1666 = vmatprep.subr.bf16.mxu0 %v1665_v53 }
 0x142   :  { %1668 = vmatpush1.bf16.msra.mxu0 %v1667_v58 }
 0x143   :  { %1670 = vmatprep.subr.bf16.mxu0 %v1669_v59 }
 0x146   :  { %1672 = vmatpush1.bf16.msra.mxu0 %v1671_v0 }
 0x147   :  { %1674 = vmatprep.subr.bf16.mxu0 %v1673_v1 }
 0x14a   :  { %1676 = vmatpush1.bf16.msra.mxu0 %v1675_v7 }
 0x14b   :  { %1678 = vmatprep.subr.bf16.mxu0 %v1677_v8 }
 0x14e   :  { %1680 = vmatpush1.bf16.msra.mxu0 %v1679_v15 }
 0x151   :  { %1023 = vmatmul.mubr.f32.vlgmr.msra.gmra.mrb[2].mxu0 %v2704_v28 }
 0x1a4   :  { %v740_v22 = vpop.f32.mrb[0].mxu0  ;;  %v882_v23 = vpop.f32.mrb[0].mxu1 }
 0x1a5   :  { %v1745_v28 = vadd.f32 %v740_v22, %v571_v18  ;;  %v1747_v24 = vadd.f32 %v882_v23, %v579_v19  ;;  %v742_v25 = vpop.f32.mrb[1].mxu0  ;;  %v884_v26 = vpop.f32.mrb[1].mxu1 }
 0x1a6   :  { %v1746_v27 = vadd.f32 %v742_v25, %v575_v20  ;;  %v1748_v29 = vadd.f32 %v884_v26, %v583_v21 }
 0x1a7   :  { %v1169_v30 = vsub.f32 0.0, %v1745_v28  ;;  %v1171_v31 = vsub.f32 0.0, %v1747_v24 }
 0x1a8   :  { %v1170_v13 = vsub.f32 0.0, %v1746_v27  ;;  %v1172_v32 = vsub.f32 0.0, %v1748_v29 }
 0x1a9   :  { %v1176_v33 = vmul.f32 1.442695, %v1169_v30  ;;  %v1180_v11 = vmul.f32 1.442695, %v1171_v31 }
 0x1aa   :  { %v1178_v34 = vmul.f32 1.442695, %v1170_v13  ;;  %v1182_v50 = vmul.f32 1.442695, %v1172_v32 }
 0x1ab   :  { %1762 = vpow2.f32 %v1176_v33 }
 0x1ac   :  { %1764 = vpow2.f32 %v1180_v11 }
 0x1ad   :  { %1766 = vpow2.f32 %v1178_v34 }
 0x1ae   :  { %1768 = vpow2.f32 %v1182_v50 }
 0x1b5   :  { %v1763_v14 = vpop.eup %1762 }
 0x1b6   :  { %v1765_v16 = vpop.eup %1764  ;;  %v1190_v35 = vadd.f32 1.0, %v1763_v14 }
 0x1b7   :  { %v1767_v36 = vpop.eup %1766  ;;  %v1192_v37 = vadd.f32 1.0, %v1765_v16 }
 0x1b8   :  { %v1769_v38 = vpop.eup %1768  ;;  %1770 = vrcp.f32 %v1190_v35  ;;  %v1191_v39 = vadd.f32 1.0, %v1767_v36 }
 0x1b9   :  { %1772 = vrcp.f32 %v1192_v37  ;;  %v1193_v40 = vadd.f32 1.0, %v1769_v38 }
 0x1ba   :  { %1774 = vrcp.f32 %v1191_v39 }
 0x1bb   :  { %1776 = vrcp.f32 %v1193_v40 }
 0x1c2   :  { %v1771_v41 = vpop.eup %1770 }
 0x1c3   :  { %v1773_v42 = vpop.eup %1772  ;;  %1204 = vst [vmem:[#allocation2] sm:$0xff] %v1771_v41 }
 0x1c4   :  { %v1775_v43 = vpop.eup %1774  ;;  %1206 = vst [vmem:[#allocation2 + $0x10] sm:$0xff] %v1773_v42 }
 0x1c5   :  { %v1777_v44 = vpop.eup %1776  ;;  %1205 = vst [vmem:[#allocation2 + $0x8] sm:$0xff] %v1775_v43  ;;  %v1259_v45 = vpop.f32.mrb[2].mxu1 }
 0x1c6   :  { %1207 = vst [vmem:[#allocation2 + $0x18] sm:$0xff] %v1777_v44  ;;  %v1260_v56 = vpop.f32.mrb[3].mxu1 }
 0x1c7   :  { %v1261_v46 = vadd.f32 %v1260_v56, %v1259_v45 }
 0x1c9   :  { %v1096_v52 = vadd.f32 %v1261_v46, %v595_v48 }
 0x1e5   :  { %v1294_v49 = vpop.f32.mrb[4].mxu1 }
 0x1e6   :  { %v1295_v51 = vpop.f32.mrb[5].mxu1 }
 0x1e7   :  { %v1296_v53 = vadd.f32 %v1295_v51, %v1294_v49 }
 0x1e9   :  { %v1166_v57 = vadd.f32 %v1296_v53, %v1096_v52 }
 0x1eb   :  { %v1175_v54 = vsub.f32 0.0, %v1166_v57 }
 0x1ed   :  { %v1188_v6 = vmul.f32 1.442695, %v1175_v54 }
 0x1ef   :  { %1778 = vpow2.f32 %v1188_v6 }
 0x1f9   :  { %v1779_v55 = vpop.eup %1778 }
 0x1fa   :  { %v1196_v58 = vadd.f32 1.0, %v1779_v55 }
 0x1fc   :  { %1780 = vrcp.f32 %v1196_v58 }
 0x206   :  { %v1781_v59 = vpop.eup %1780 }
 0x207   :  { %1211 = vst.msk [vmem:[#allocation2 + $0x30] sm:$0xff] %vm1210_vm0, %v1781_v59 }
 0x224   :  { %v1024_v0 = vpop.f32.mrb[2].mxu0 }
 0x225   :  { %v1749_v1 = vadd.f32 %v1024_v0, %v587_v62  ;;  %v1026_v2 = vpop.f32.mrb[3].mxu0 }
 0x226   :  { %v1750_v3 = vadd.f32 %v1026_v2, %v591_v63 }
 0x227   :  { %v1173_v4 = vsub.f32 0.0, %v1749_v1 }
 0x228   :  { %v1174_v5 = vsub.f32 0.0, %v1750_v3 }
 0x229   :  { %v1184_v7 = vmul.f32 1.442695, %v1173_v4 }
 0x22a   :  { %v1186_v8 = vmul.f32 1.442695, %v1174_v5 }
 0x22b   :  { %1782 = vpow2.f32 %v1184_v7 }
 0x22c   :  { %1784 = vpow2.f32 %v1186_v8 }
 0x235   :  { %v1783_v9 = vpop.eup %1782 }
 0x236   :  { %v1785_v12 = vpop.eup %1784  ;;  %v1194_v15 = vadd.f32 1.0, %v1783_v9 }
 0x237   :  { %v1195_v18 = vadd.f32 1.0, %v1785_v12 }
 0x238   :  { %1786 = vrcp.f32 %v1194_v15 }
 0x239   :  { %1788 = vrcp.f32 %v1195_v18 }
 0x242   :  { %v1787_v10 = vpop.eup %1786 }
 0x243   :  { %v1789_v17 = vpop.eup %1788  ;;  %1208 = vst [vmem:[#allocation2 + $0x20] sm:$0xff] %v1787_v10 }
 0x244   :  { %1209 = vst [vmem:[#allocation2 + $0x28] sm:$0xff] %v1789_v17 }
 0x245   :  { %1801 = shalt.err (!%p1798_p4)
}
 0x246   :  { %s1802_s23 = scalar_lea.hbm %s3292_s5, 896 }
 0x247   :  { %p1803_p5 = scmp.ne.s32.totalorder %s3292_s5, %s1802_s23  ;;  %p1806_p6 = scmp.lt.u32.totalorder %s1802_s23, %s3292_s5 }
 0x249   :  { %p1808_p7 = pnand %p1806_p6, %p1803_p5 }
 0x24b   :  { %1811 = shalt.err (!%p1808_p7)
}
 0x24c   :  { %1221 = dma.vmem_to_hbm [thread:$0]  %s1219_s4, 896, %s3292_s5, [#allocation3]  }
 0x24d   :  { %1812 = dma.done.wait [#allocation3], 896  }
 0x24e   :  { %1813 = vsyncadd [#allocation3], 4294966400 }
 0x24f   :  { %1225 = vsyncpa [#allocation3], 1 }

</bundles_post_ra>
